<compile_context>
chip_gen: v7x
topology: tpu7x:2x2x1
jax: 0.10.0
libtpu: 0.0.40
codegen_flags: <defaults>
</compile_context>

<pallas_src>
import functools

import jax
import jax.numpy as jnp
from jax.experimental import pallas as pl
from jax.experimental.pallas import tpu as pltpu

_NEG_INF = -1e30  # finite "minus infinity": padded edges never win the max, exp -> 0


def _info_nce_kernel(xs_ref, xt_ref, e0_ref, pos_ref, out_ref,
                     s_sc, m_sc, denom_sc, lsum_sc, cnt_sc,
                     *, tau, dist_metric, n_edges):
    p = pl.program_id(0)            # phase: 0 = sim/max/denominator, 1 = loss
    j = pl.program_id(1)            # edge block
    nb = pl.num_programs(1)

    e0 = e0_ref[...]                # (1, EB) int32, source node per edge
    pos = pos_ref[...]              # (1, EB) f32 in {0, 1}
    eb = pos.shape[1]
    n_pad = denom_sc.shape[1]

    # Edge validity derived from the global edge index (tail of last block is pad).
    lane = jax.lax.broadcasted_iota(jnp.int32, (1, eb), 1)
    valid = (j * eb + lane) < n_edges                       # (1, EB) bool

    # onehot_t[n, e] = (e0[e] == n).  Built from a sublane iota against the
    # lane-dense e0 row so it feeds the MXU dots in both phases directly.
    node_iota = jax.lax.broadcasted_iota(jnp.int32, (n_pad, eb), 0)
    onehot_t = (node_iota == e0).astype(jnp.float32)        # (n_pad, EB)

    @pl.when((p == 0) & (j == 0))
    def _init():
        m_sc[...] = jnp.full_like(m_sc, _NEG_INF)
        denom_sc[...] = jnp.zeros_like(denom_sc)
        lsum_sc[...] = jnp.zeros_like(lsum_sc)
        cnt_sc[...] = jnp.zeros_like(cnt_sc)

    # ---- phase 0: similarity, online max, rescaled negative-denominator scatter
    @pl.when(p == 0)
    def _phase0():
        xs = xs_ref[...].astype(jnp.float32)                # (D, EB), edges on lanes
        xt = xt_ref[...].astype(jnp.float32)
        if dist_metric == "cosine":
            dot = jnp.sum(xs * xt, axis=0, keepdims=True)   # (1, EB) sublane reduce
            n0 = jnp.sqrt(jnp.sum(xs * xs, axis=0, keepdims=True))
            n1 = jnp.sqrt(jnp.sum(xt * xt, axis=0, keepdims=True))
            sim = dot / jnp.maximum(n0 * n1, 1e-8)
        elif dist_metric == "l2_rbf":
            d = jnp.sqrt(jnp.sum((xs - xt) ** 2, axis=0, keepdims=True))
            sim = jnp.exp(-d / (2.0 * 0.75 ** 2))
        elif dist_metric == "l2":
            sim = jnp.sqrt(jnp.sum((xs - xt) ** 2, axis=0, keepdims=True))
        else:
            raise NotImplementedError(f"Distance metric {dist_metric}")
        s = sim * (1.0 / tau)
        s = jnp.where(valid, s, _NEG_INF)                   # mask padded edges
        s_sc[j] = s                                         # cache RAW s for phase 1

        m_old = m_sc[...]                                   # (1, 1)
        m_new = jnp.maximum(m_old, jnp.max(s))
        # Online softmax: bring the running denominator to the new max scale.
        # First block: m_old = -1e30 -> rescale = 0 (denominator is 0 anyway).
        rescale = jnp.exp(m_old - m_new)
        contrib = jnp.exp(s - m_new) * (1.0 - pos)          # negatives only; pad -> 0
        # Scatter-add by source node on the MXU: (1,EB) x (n_pad,EB)^T -> (1,n_pad).
        scat = jax.lax.dot_general(
            contrib, onehot_t,
            dimension_numbers=(((1,), (1,)), ((), ())),
            precision=jax.lax.Precision.HIGHEST,
            preferred_element_type=jnp.float32)
        denom_sc[...] = denom_sc[...] * rescale + scat
        m_sc[...] = m_new

    # ---- phase 1: gather denominator per edge (MXU), per-positive loss, mean ----
    @pl.when(p == 1)
    def _phase1():
        num = jnp.exp(s_sc[j] - m_sc[...])                  # exp(s - global max), (1,EB)
        den_row = jnp.maximum(denom_sc[...], 0.0)           # .clamp(min=0), (1, n_pad)
        # Gather den_row[e0] for every edge as a (1,n_pad) @ (n_pad,EB) MXU dot.
        den_e = jnp.dot(den_row, onehot_t,
                        precision=jax.lax.Precision.HIGHEST,
                        preferred_element_type=jnp.float32)  # (1, EB)
        term = -jnp.log(num / (num + den_e))
        lsum_sc[...] += jnp.sum(jnp.where(pos > 0.5, term, 0.0))
        cnt_sc[...] += jnp.sum(pos)

        @pl.when(j == nb - 1)
        def _final():
            # NaN if there are no valid positive pairs -- same as the reference.
            out_ref[...] = lsum_sc[...] / cnt_sc[...]


def knn_info_nce_loss(x, edge_index, cluster_ids, recons, pts,
                      *, tau, dist_metric, pt_thres=0.9, edge_block=2048):
    """Pallas equivalent of knnInfoNCELoss(tau, dist_metric)(x, edge_index, ...)."""
    n_nodes, feat_dim = x.shape
    n_edges = edge_index.shape[1]

    e0 = edge_index[0].astype(jnp.int32)
    e1 = edge_index[1].astype(jnp.int32)

    # Per-node validity and per-edge positive mask (cheap integer bookkeeping).
    valid_node = (recons != 0) & (pts > pt_thres)
    pos = (cluster_ids[e0] == cluster_ids[e1]) & valid_node[e0] & valid_node[e1]

    # Lane-dense edge blocking: edges live on the 128-lane axis, so the block
    # size must be a multiple of 128.
    edge_block = max(128, (int(edge_block) // 128) * 128)
    edge_block = min(edge_block, pl.cdiv(n_edges, 128) * 128)
    e_pad = pl.cdiv(n_edges, edge_block) * edge_block
    pad = e_pad - n_edges
    e0_p = jnp.pad(e0, (0, pad))
    e1_p = jnp.pad(e1, (0, pad))
    pos_p = jnp.pad(pos, (0, pad)).astype(jnp.float32)

    # TODO(synk): move these row gathers in-kernel (VMEM-resident x / DMA gather)
    # to avoid the 2*E*D HBM round trip; kept in the wrapper for lowering safety.
    x_t = x.T                                      # (D, N)
    xs_t = jnp.take(x_t, e0_p, axis=1)             # (D, e_pad), edges lane-dense
    xt_t = jnp.take(x_t, e1_p, axis=1)

    n_pad = pl.cdiv(n_nodes, 128) * 128            # lane width of the denominator row
    n_blocks = e_pad // edge_block

    kernel = functools.partial(_info_nce_kernel, tau=float(tau),
                               dist_metric=dist_metric, n_edges=int(n_edges))

    # Feature blocks are only read in phase 0; afterwards the index map pins
    # block 0 so the pipeline does not re-stream them in phase 1.
    feat_spec = pl.BlockSpec((feat_dim, edge_block), lambda p, j: (0, j * (1 - p)))
    edge_spec = pl.BlockSpec((1, edge_block), lambda p, j: (0, j))

    # Explicit VMEM budget (double buffers + scratch), with headroom.
    def _rup(v, m):
        return (v + m - 1) // m * m

    itemsize = jnp.dtype(x.dtype).itemsize
    feat_bytes = 2 * 2 * _rup(feat_dim, 8) * edge_block * itemsize   # xs/xt, 2 buffers
    edge_bytes = 2 * 2 * 8 * edge_block * 4                          # e0/pos, 2 buffers
    cache_bytes = n_blocks * 8 * edge_block * 4                      # raw-s cache
    denom_bytes = 8 * n_pad * 4
    vmem_est = feat_bytes + edge_bytes + cache_bytes + denom_bytes + (1 << 20)
    # Keep the limit within the smallest physical VMEM of the listed targets
    # (v7x: 64 MiB); shrink edge_block for very large problems.
    vmem_limit = max(32 << 20, min(int(1.5 * vmem_est) + (4 << 20), 96 << 20))

    out = pl.pallas_call(
        kernel,
        out_shape=jax.ShapeDtypeStruct((1, 1), jnp.float32),
        grid_spec=pltpu.PrefetchScalarGridSpec(
            num_scalar_prefetch=0,
            grid=(2, n_blocks),                    # (phase, edge block)
            in_specs=[feat_spec, feat_spec, edge_spec, edge_spec],
            out_specs=pl.BlockSpec((1, 1), lambda p, j: (0, 0)),
            scratch_shapes=[
                pltpu.VMEM((n_blocks, 1, edge_block), jnp.float32),  # raw s cache
                pltpu.VMEM((1, 1), jnp.float32),       # running global max
                pltpu.VMEM((1, n_pad), jnp.float32),   # per-node denominator
                pltpu.VMEM((1, 1), jnp.float32),       # loss sum
                pltpu.VMEM((1, 1), jnp.float32),       # positive-pair count
            ],
        ),
        compiler_params=pltpu.CompilerParams(
            dimension_semantics=("arbitrary", "arbitrary"),
            vmem_limit_bytes=vmem_limit,
        ),
    )(xs_t, xt_t, e0_p[None, :], pos_p[None, :])

    return out[0, 0]


def _knn_info_nce_ref(x, edge_index, cluster_ids, recons, pts,
                      *, tau, dist_metric, pt_thres=0.9):
    e0, e1 = edge_index[0], edge_index[1]
    valid = (recons != 0) & (pts > pt_thres)
    pos = (cluster_ids[e0] == cluster_ids[e1]) & valid[e0] & valid[e1]
    neg = ~pos
    xs = x[e0].astype(jnp.float32)
    xt = x[e1].astype(jnp.float32)
    if dist_metric == "cosine":
        dot = jnp.sum(xs * xt, axis=-1)
        nrm = jnp.linalg.norm(xs, axis=-1) * jnp.linalg.norm(xt, axis=-1)
        sim = dot / jnp.maximum(nrm, 1e-8)
    elif dist_metric == "l2_rbf":
        sim = jnp.exp(-jnp.linalg.norm(xs - xt, axis=-1) / (2.0 * 0.75 ** 2))
    elif dist_metric == "l2":
        sim = jnp.linalg.norm(xs - xt, axis=-1)
    else:
        raise NotImplementedError(dist_metric)
    s = sim / tau
    m = jnp.max(s)
    exp_s = jnp.exp(s - m)
    denom = jnp.zeros((x.shape[0],), jnp.float32).at[e0].add(
        jnp.where(neg, exp_s, 0.0))
    denom = jnp.clip(denom, 0.0)
    den_e = denom[e0]
    term = -jnp.log(exp_s / (exp_s + den_e))
    return jnp.sum(jnp.where(pos, term, 0.0)) / jnp.sum(pos)


if __name__ == "__main__":
    key = jax.random.PRNGKey(0)
    kx, kc, kr, kp, k0, k1 = jax.random.split(key, 6)

    n_nodes, feat_dim, n_edges = 64, 32, 512
    x = jax.random.normal(kx, (n_nodes, feat_dim), dtype=jnp.float32)
    cluster_ids = jax.random.randint(kc, (n_nodes,), 0, 8)
    recons = (jax.random.uniform(kr, (n_nodes,)) > 0.1).astype(jnp.float32)
    pts = jax.random.uniform(kp, (n_nodes,), minval=0.5, maxval=1.5)
    e0 = jax.random.randint(k0, (n_edges,), 0, n_nodes)
    e1 = jax.random.randint(k1, (n_edges,), 0, n_nodes)

    # Guarantee at least one valid positive pair.
    cluster_ids = cluster_ids.at[1].set(cluster_ids[0])
    recons = recons.at[0].set(1.0).at[1].set(1.0)
    pts = pts.at[0].set(1.2).at[1].set(1.2)
    e0 = e0.at[0].set(0)
    e1 = e1.at[0].set(1)
    edge_index = jnp.stack([e0, e1]).astype(jnp.int32)

    tau, dist_metric = 0.1, "cosine"

    # edge_block=256 -> 2 edge blocks: exercises cross-block online rescaling.
    out = knn_info_nce_loss(x, edge_index, cluster_ids, recons, pts,
                            tau=tau, dist_metric=dist_metric, edge_block=256)
    out = jax.block_until_ready(out)

    ref = _knn_info_nce_ref(x, edge_index, cluster_ids, recons, pts,
                            tau=tau, dist_metric=dist_metric)
    # Tolerance leaves room for MXU pass precision and online-rescaling order.
    assert jnp.isfinite(out), out
    assert jnp.allclose(out, ref, rtol=2e-3, atol=1e-5), (out, ref)

    print("KERNEL_OK")
</pallas_src>

<mosaic_0001>
module attributes {stable_mosaic.version = 11 : i64} {
  func.func @_info_nce_kernel(%arg0: i32, %arg1: i32, %arg2: memref<32x256xf32, #tpu.memory_space<vmem>>, %arg3: memref<32x256xf32, #tpu.memory_space<vmem>>, %arg4: memref<1x256xi32, #tpu.memory_space<vmem>>, %arg5: memref<1x256xf32, #tpu.memory_space<vmem>>, %arg6: memref<1x1xf32, #tpu.memory_space<vmem>>, %arg7: memref<2x1x256xf32, #tpu.memory_space<vmem>>, %arg8: memref<1x1xf32, #tpu.memory_space<vmem>>, %arg9: memref<1x128xf32, #tpu.memory_space<vmem>>, %arg10: memref<1x1xf32, #tpu.memory_space<vmem>>, %arg11: memref<1x1xf32, #tpu.memory_space<vmem>>) attributes {dimension_semantics = [#tpu.dimension_semantics<arbitrary>, #tpu.dimension_semantics<arbitrary>], iteration_bounds = array<i64: 2, 2>, scalar_prefetch = 0 : i64, scratch_operands = 5 : i64, tpu.core_type = #tpu.core_type<tc>, window_params = [{transform_indices = @transform_0, window_bounds = array<i64: 32, 256>}, {transform_indices = @transform_1, window_bounds = array<i64: 32, 256>}, {transform_indices = @transform_2, window_bounds = array<i64: 1, 256>}, {transform_indices = @transform_3, window_bounds = array<i64: 1, 256>}, {pipeline_mode = #tpu.pipeline_mode<synchronous>, transform_indices = @transform_4, window_bounds = array<i64: 1, 1>}]} {
    %c0 = arith.constant 0 : index
    %c0_0 = arith.constant 0 : index
    %0 = vector.load %arg4[%c0, %c0_0] : memref<1x256xi32, #tpu.memory_space<vmem>>, vector<1x256xi32>
    %c0_1 = arith.constant 0 : index
    %c0_2 = arith.constant 0 : index
    %1 = vector.load %arg5[%c0_1, %c0_2] : memref<1x256xf32, #tpu.memory_space<vmem>>, vector<1x256xf32>
    %2 = tpu.iota {dimensions = array<i32: 1>} : vector<1x256xi32>
    %c256_i32 = arith.constant 256 : i32
    %3 = arith.muli %arg1, %c256_i32 : i32
    %4 = vector.broadcast %3 : i32 to vector<1x256xi32>
    %5 = arith.addi %4, %2 : vector<1x256xi32>
    %c512_i32 = arith.constant 512 : i32
    %6 = vector.broadcast %c512_i32 : i32 to vector<1x256xi32>
    %7 = arith.cmpi slt, %5, %6 : vector<1x256xi32>
    %8 = tpu.iota {dimensions = array<i32: 0>} : vector<128x256xi32>
    %9 = vector.broadcast %0 : vector<1x256xi32> to vector<128x256xi32>
    %10 = arith.cmpi eq, %8, %9 : vector<128x256xi32>
    %11 = arith.extui %10 : vector<128x256xi1> to vector<128x256xi32>
    %12 = arith.sitofp %11 : vector<128x256xi32> to vector<128x256xf32>
    %c0_i32 = arith.constant 0 : i32
    %13 = arith.cmpi eq, %arg0, %c0_i32 : i32
    %c0_i32_3 = arith.constant 0 : i32
    %14 = arith.cmpi eq, %arg1, %c0_i32_3 : i32
    %15 = arith.andi %13, %14 : i1
    %16 = arith.extui %15 : i1 to i32
    %c0_i32_4 = arith.constant 0 : i32
    %17 = arith.cmpi ne, %16, %c0_i32_4 : i32
    scf.if %17 {
      %cst = arith.constant -1.000000e+30 : f32
      %24 = vector.broadcast %cst : f32 to vector<1x1xf32>
      %c0_8 = arith.constant 0 : index
      %c0_9 = arith.constant 0 : index
      %25 = vector.load %arg8[%c0_8, %c0_9] : memref<1x1xf32, #tpu.memory_space<vmem>>, vector<1x1xf32>
      tpu.vector_store %arg8[%c0_8, %c0_9], %24 {strides = array<i32>} : memref<1x1xf32, #tpu.memory_space<vmem>>, vector<1x1xf32>,
      %cst_10 = arith.constant 0.000000e+00 : f32
      %26 = vector.broadcast %cst_10 : f32 to vector<1x128xf32>
      %c0_11 = arith.constant 0 : index
      %c0_12 = arith.constant 0 : index
      %27 = vector.load %arg9[%c0_11, %c0_12] : memref<1x128xf32, #tpu.memory_space<vmem>>, vector<1x128xf32>
      tpu.vector_store %arg9[%c0_11, %c0_12], %26 {strides = array<i32>} : memref<1x128xf32, #tpu.memory_space<vmem>>, vector<1x128xf32>,
      %cst_13 = arith.constant 0.000000e+00 : f32
      %28 = vector.broadcast %cst_13 : f32 to vector<1x1xf32>
      %c0_14 = arith.constant 0 : index
      %c0_15 = arith.constant 0 : index
      %29 = vector.load %arg10[%c0_14, %c0_15] : memref<1x1xf32, #tpu.memory_space<vmem>>, vector<1x1xf32>
      tpu.vector_store %arg10[%c0_14, %c0_15], %28 {strides = array<i32>} : memref<1x1xf32, #tpu.memory_space<vmem>>, vector<1x1xf32>,
      %cst_16 = arith.constant 0.000000e+00 : f32
      %30 = vector.broadcast %cst_16 : f32 to vector<1x1xf32>
      %c0_17 = arith.constant 0 : index
      %c0_18 = arith.constant 0 : index
      %31 = vector.load %arg11[%c0_17, %c0_18] : memref<1x1xf32, #tpu.memory_space<vmem>>, vector<1x1xf32>
      tpu.vector_store %arg11[%c0_17, %c0_18], %30 {strides = array<i32>} : memref<1x1xf32, #tpu.memory_space<vmem>>, vector<1x1xf32>,
    } else {
    }
    %c0_i32_5 = arith.constant 0 : i32
    %18 = arith.cmpi eq, %arg0, %c0_i32_5 : i32
    %19 = arith.extui %18 : i1 to i32
    %c0_i32_6 = arith.constant 0 : i32
    %20 = arith.cmpi ne, %19, %c0_i32_6 : i32
    scf.if %20 {
      %c0_8 = arith.constant 0 : index
      %c0_9 = arith.constant 0 : index
      %24 = vector.load %arg2[%c0_8, %c0_9] : memref<32x256xf32, #tpu.memory_space<vmem>>, vector<32x256xf32>
      %c0_10 = arith.constant 0 : index
      %c0_11 = arith.constant 0 : index
      %25 = vector.load %arg3[%c0_10, %c0_11] : memref<32x256xf32, #tpu.memory_space<vmem>>, vector<32x256xf32>
      %26 = arith.mulf %24, %25 : vector<32x256xf32>
      %cst = arith.constant dense<0.000000e+00> : vector<256xf32>
      %27 = vector.multi_reduction <add>, %26, %cst [0] : vector<32x256xf32> to vector<256xf32>
      %28 = vector.shape_cast %27 : vector<256xf32> to vector<1x256xf32>
      %29 = arith.mulf %24, %24 : vector<32x256xf32>
      %cst_12 = arith.constant dense<0.000000e+00> : vector<256xf32>
      %30 = vector.multi_reduction <add>, %29, %cst_12 [0] : vector<32x256xf32> to vector<256xf32>
      %31 = vector.shape_cast %30 : vector<256xf32> to vector<1x256xf32>
      %32 = math.sqrt %31 : vector<1x256xf32>
      %33 = arith.mulf %25, %25 : vector<32x256xf32>
      %cst_13 = arith.constant dense<0.000000e+00> : vector<256xf32>
      %34 = vector.multi_reduction <add>, %33, %cst_13 [0] : vector<32x256xf32> to vector<256xf32>
      %35 = vector.shape_cast %34 : vector<256xf32> to vector<1x256xf32>
      %36 = math.sqrt %35 : vector<1x256xf32>
      %37 = arith.mulf %32, %36 : vector<1x256xf32>
      %cst_14 = arith.constant 9.99999993E-9 : f32
      %38 = vector.broadcast %cst_14 : f32 to vector<1x256xf32>
      %39 = arith.maximumf %37, %38 : vector<1x256xf32>
      %40 = arith.divf %28, %39 : vector<1x256xf32>
      %cst_15 = arith.constant 1.000000e+01 : f32
      %41 = vector.broadcast %cst_15 : f32 to vector<1x256xf32>
      %42 = arith.mulf %40, %41 : vector<1x256xf32>
      %cst_16 = arith.constant -1.000000e+30 : f32
      %43 = vector.broadcast %cst_16 : f32 to vector<1x256xf32>
      %44 = arith.select %7, %42, %43 : vector<1x256xi1>, vector<1x256xf32>
      %45 = arith.index_cast %arg1 : i32 to index
      %c0_17 = arith.constant 0 : index
      %c0_18 = arith.constant 0 : index
      %46 = vector.load %arg7[%45, %c0_17, %c0_18] : memref<2x1x256xf32, #tpu.memory_space<vmem>>, vector<1x1x256xf32>
      %47 = vector.shape_cast %46 : vector<1x1x256xf32> to vector<1x256xf32>
      %48 = vector.shape_cast %44 : vector<1x256xf32> to vector<1x1x256xf32>
      tpu.vector_store %arg7[%45, %c0_17, %c0_18], %48 {strides = array<i32>} : memref<2x1x256xf32, #tpu.memory_space<vmem>>, vector<1x1x256xf32>,
      %c0_19 = arith.constant 0 : index
      %c0_20 = arith.constant 0 : index
      %49 = vector.load %arg8[%c0_19, %c0_20] : memref<1x1xf32, #tpu.memory_space<vmem>>, vector<1x1xf32>
      %50 = vector.shape_cast %44 : vector<1x256xf32> to vector<1x1x256xf32>
      %cst_21 = arith.constant dense<0xFF800000> : vector<1xf32>
      %51 = vector.multi_reduction <maximumf>, %50, %cst_21 [1, 2] : vector<1x1x256xf32> to vector<1xf32>
      %52 = vector.shape_cast %51 : vector<1xf32> to vector<1x1x1xf32>
      %53 = vector.extract %52[0, 0, 0] : f32 from vector<1x1x1xf32>
      %54 = vector.broadcast %53 : f32 to vector<1x1xf32>
      %55 = arith.maximumf %49, %54 : vector<1x1xf32>
      %56 = arith.subf %49, %55 : vector<1x1xf32>
      %57 = math.exp %56 : vector<1x1xf32>
      %58 = vector.broadcast %55 : vector<1x1xf32> to vector<1x256xf32>
      %59 = arith.subf %44, %58 : vector<1x256xf32>
      %60 = math.exp %59 : vector<1x256xf32>
      %cst_22 = arith.constant 1.000000e+00 : f32
      %61 = vector.broadcast %cst_22 : f32 to vector<1x256xf32>
      %62 = arith.subf %61, %1 : vector<1x256xf32>
      %63 = arith.mulf %60, %62 : vector<1x256xf32>
      %cst_23 = arith.constant dense<0.000000e+00> : vector<1x128xf32>
      %64 = tpu.matmul %63, %12, %cst_23 {dimension_numbers = #tpu.dot_dimension_numbers<[1], [1], [0], [0], [0, 0, 1, 0], [], []>, precision = #tpu.contract_precision<fp32>} : vector<1x256xf32>, vector<128x256xf32>, vector<1x128xf32> -> vector<1x128xf32>
      %c0_24 = arith.constant 0 : index
      %c0_25 = arith.constant 0 : index
      %65 = vector.load %arg9[%c0_24, %c0_25] : memref<1x128xf32, #tpu.memory_space<vmem>>, vector<1x128xf32>
      %66 = vector.broadcast %57 : vector<1x1xf32> to vector<1x128xf32>
      %67 = arith.mulf %65, %66 : vector<1x128xf32>
      %68 = arith.addf %67, %64 : vector<1x128xf32>
      %c0_26 = arith.constant 0 : index
      %c0_27 = arith.constant 0 : index
      %69 = vector.load %arg9[%c0_26, %c0_27] : memref<1x128xf32, #tpu.memory_space<vmem>>, vector<1x128xf32>
      tpu.vector_store %arg9[%c0_26, %c0_27], %68 {strides = array<i32>} : memref<1x128xf32, #tpu.memory_space<vmem>>, vector<1x128xf32>,
      %c0_28 = arith.constant 0 : index
      %c0_29 = arith.constant 0 : index
      %70 = vector.load %arg8[%c0_28, %c0_29] : memref<1x1xf32, #tpu.memory_space<vmem>>, vector<1x1xf32>
      tpu.vector_store %arg8[%c0_28, %c0_29], %55 {strides = array<i32>} : memref<1x1xf32, #tpu.memory_space<vmem>>, vector<1x1xf32>,
    } else {
    }
    %c1_i32 = arith.constant 1 : i32
    %21 = arith.cmpi eq, %arg0, %c1_i32 : i32
    %22 = arith.extui %21 : i1 to i32
    %c0_i32_7 = arith.constant 0 : i32
    %23 = arith.cmpi ne, %22, %c0_i32_7 : i32
    scf.if %23 {
      %24 = arith.index_cast %arg1 : i32 to index
      %c0_8 = arith.constant 0 : index
      %c0_9 = arith.constant 0 : index
      %25 = vector.load %arg7[%24, %c0_8, %c0_9] : memref<2x1x256xf32, #tpu.memory_space<vmem>>, vector<1x1x256xf32>
      %26 = vector.shape_cast %25 : vector<1x1x256xf32> to vector<1x256xf32>
      %c0_10 = arith.constant 0 : index
      %c0_11 = arith.constant 0 : index
      %27 = vector.load %arg8[%c0_10, %c0_11] : memref<1x1xf32, #tpu.memory_space<vmem>>, vector<1x1xf32>
      %28 = vector.broadcast %27 : vector<1x1xf32> to vector<1x256xf32>
      %29 = arith.subf %26, %28 : vector<1x256xf32>
      %30 = math.exp %29 : vector<1x256xf32>
      %c0_12 = arith.constant 0 : index
      %c0_13 = arith.constant 0 : index
      %31 = vector.load %arg9[%c0_12, %c0_13] : memref<1x128xf32, #tpu.memory_space<vmem>>, vector<1x128xf32>
      %cst = arith.constant 0.000000e+00 : f32
      %32 = vector.broadcast %cst : f32 to vector<1x128xf32>
      %33 = arith.maximumf %31, %32 : vector<1x128xf32>
      %cst_14 = arith.constant dense<0.000000e+00> : vector<1x256xf32>
      %34 = tpu.matmul %33, %12, %cst_14 {dimension_numbers = #tpu.dot_dimension_numbers<[1], [0], [0], [1], [0, 0, 1, 1], [], []>, precision = #tpu.contract_precision<fp32>} : vector<1x128xf32>, vector<128x256xf32>, vector<1x256xf32> -> vector<1x256xf32>
      %35 = arith.addf %30, %34 : vector<1x256xf32>
      %36 = arith.divf %30, %35 : vector<1x256xf32>
      %37 = math.log %36 : vector<1x256xf32>
      %cst_15 = arith.constant 0.000000e+00 : f32
      %38 = vector.broadcast %cst_15 : f32 to vector<1x256xf32>
      %39 = arith.subf %38, %37 : vector<1x256xf32>
      %c0_16 = arith.constant 0 : index
      %c0_17 = arith.constant 0 : index
      %40 = vector.load %arg10[%c0_16, %c0_17] : memref<1x1xf32, #tpu.memory_space<vmem>>, vector<1x1xf32>
      %cst_18 = arith.constant 5.000000e-01 : f32
      %41 = vector.broadcast %cst_18 : f32 to vector<1x256xf32>
      %42 = arith.cmpf ogt, %1, %41 : vector<1x256xf32>
      %cst_19 = arith.constant 0.000000e+00 : f32
      %43 = vector.broadcast %cst_19 : f32 to vector<1x256xf32>
      %44 = arith.select %42, %39, %43 : vector<1x256xi1>, vector<1x256xf32>
      %45 = vector.shape_cast %44 : vector<1x256xf32> to vector<1x1x256xf32>
      %cst_20 = arith.constant dense<0.000000e+00> : vector<1xf32>
      %46 = vector.multi_reduction <add>, %45, %cst_20 [1, 2] : vector<1x1x256xf32> to vector<1xf32>
      %47 = vector.shape_cast %46 : vector<1xf32> to vector<1x1x1xf32>
      %48 = vector.extract %47[0, 0, 0] : f32 from vector<1x1x1xf32>
      %49 = vector.broadcast %48 : f32 to vector<1x1xf32>
      %50 = arith.addf %40, %49 : vector<1x1xf32>
      %c0_21 = arith.constant 0 : index
      %c0_22 = arith.constant 0 : index
      %51 = vector.load %arg10[%c0_21, %c0_22] : memref<1x1xf32, #tpu.memory_space<vmem>>, vector<1x1xf32>
      tpu.vector_store %arg10[%c0_21, %c0_22], %50 {strides = array<i32>} : memref<1x1xf32, #tpu.memory_space<vmem>>, vector<1x1xf32>,
      %c0_23 = arith.constant 0 : index
      %c0_24 = arith.constant 0 : index
      %52 = vector.load %arg11[%c0_23, %c0_24] : memref<1x1xf32, #tpu.memory_space<vmem>>, vector<1x1xf32>
      %53 = vector.shape_cast %1 : vector<1x256xf32> to vector<1x1x256xf32>
      %cst_25 = arith.constant dense<0.000000e+00> : vector<1xf32>
      %54 = vector.multi_reduction <add>, %53, %cst_25 [1, 2] : vector<1x1x256xf32> to vector<1xf32>
      %55 = vector.shape_cast %54 : vector<1xf32> to vector<1x1x1xf32>
      %56 = vector.extract %55[0, 0, 0] : f32 from vector<1x1x1xf32>
      %57 = vector.broadcast %56 : f32 to vector<1x1xf32>
      %58 = arith.addf %52, %57 : vector<1x1xf32>
      %c0_26 = arith.constant 0 : index
      %c0_27 = arith.constant 0 : index
      %59 = vector.load %arg11[%c0_26, %c0_27] : memref<1x1xf32, #tpu.memory_space<vmem>>, vector<1x1xf32>
      tpu.vector_store %arg11[%c0_26, %c0_27], %58 {strides = array<i32>} : memref<1x1xf32, #tpu.memory_space<vmem>>, vector<1x1xf32>,
      %c1_i32_28 = arith.constant 1 : i32
      %60 = arith.cmpi eq, %arg1, %c1_i32_28 : i32
      %61 = arith.extui %60 : i1 to i32
      %c0_i32_29 = arith.constant 0 : i32
      %62 = arith.cmpi ne, %61, %c0_i32_29 : i32
      scf.if %62 {
        %c0_30 = arith.constant 0 : index
        %c0_31 = arith.constant 0 : index
        %63 = vector.load %arg10[%c0_30, %c0_31] : memref<1x1xf32, #tpu.memory_space<vmem>>, vector<1x1xf32>
        %c0_32 = arith.constant 0 : index
        %c0_33 = arith.constant 0 : index
        %64 = vector.load %arg11[%c0_32, %c0_33] : memref<1x1xf32, #tpu.memory_space<vmem>>, vector<1x1xf32>
        %65 = arith.divf %63, %64 : vector<1x1xf32>
        %c0_34 = arith.constant 0 : index
        %c0_35 = arith.constant 0 : index
        %66 = vector.load %arg6[%c0_34, %c0_35] : memref<1x1xf32, #tpu.memory_space<vmem>>, vector<1x1xf32>
        tpu.vector_store %arg6[%c0_34, %c0_35], %65 {strides = array<i32>} : memref<1x1xf32, #tpu.memory_space<vmem>>, vector<1x1xf32>,
      } else {
      }
    } else {
    }
    return
  }
  func.func @transform_0(%arg0: i32, %arg1: i32) -> (i32, i32) {
    %c1_i32 = arith.constant 1 : i32
    %0 = arith.subi %c1_i32, %arg0 : i32
    %1 = arith.muli %arg1, %0 : i32
    %c0_i32 = arith.constant 0 : i32
    %c0_i32_0 = arith.constant 0 : i32
    return %c0_i32, %1 : i32, i32
  }
  func.func @transform_1(%arg0: i32, %arg1: i32) -> (i32, i32) {
    %c1_i32 = arith.constant 1 : i32
    %0 = arith.subi %c1_i32, %arg0 : i32
    %1 = arith.muli %arg1, %0 : i32
    %c0_i32 = arith.constant 0 : i32
    %c0_i32_0 = arith.constant 0 : i32
    return %c0_i32, %1 : i32, i32
  }
  func.func @transform_2(%arg0: i32, %arg1: i32) -> (i32, i32) {
    %c0_i32 = arith.constant 0 : i32
    %c0_i32_0 = arith.constant 0 : i32
    return %c0_i32, %arg1 : i32, i32
  }
  func.func @transform_3(%arg0: i32, %arg1: i32) -> (i32, i32) {
    %c0_i32 = arith.constant 0 : i32
    %c0_i32_0 = arith.constant 0 : i32
    return %c0_i32, %arg1 : i32, i32
  }
  func.func @transform_4(%arg0: i32, %arg1: i32) -> (i32, i32) {
    %c0_i32 = arith.constant 0 : i32
    %c0_i32_0 = arith.constant 0 : i32
    %c0_i32_1 = arith.constant 0 : i32
    return %c0_i32, %c0_i32_0 : i32, i32
  }
}

</mosaic_0001>

<bundles_post_ra>
// kernel: tpu_custom_call.1
= control target key start
LH: loop header
LB: loop body
LE: loop exit
PB: predicated region body
PF: predicated region fallthrough
CT: control target
= control target key end

     0   :  { %s5456_s0 = inlined_call_operand.hbm [shape: f32[32,512], index: 0, kind: input, shape index: {}]   ;;  %s5457_s1 = inlined_call_operand.hbm [shape: f32[32,512], index: 1, kind: input, shape index: {}]   ;;  %s5458_s2 = inlined_call_operand.vmem [shape: s32[1,512], index: 2, kind: input, shape index: {}]   ;;  %s5459_s3 = inlined_call_operand.vmem [shape: f32[1,512], index: 3, kind: input, shape index: {}]   ;;  %s5460_s4 = inlined_call_operand.hbm [shape: f32[1,1], index: 4, kind: output, shape index: {}]  }
   0x1   :  { %5622 = sst [smem:[#allocation98_spill]] %s5456_s0 }
   0x2   :  { %9 = vsyncpa [#allocation8], 0 }
   0x3   :  { %11 = vsyncpa [#allocation8 + $0x1], 0 }
   0x4   :  { %12 = vsyncpa [#allocation11], 0 }
   0x5   :  { %14 = vsyncpa [#allocation11 + $0x1], 0 }
   0x6   :  { %15 = vsyncpa [#allocation9], 0  ;;  %s3593_s15 = smov 0   ;;  %s3595_s16 = smov 0  }
   0x7   :  { %s3597_s17 = smov 0   ;;  %s3599_s18 = smov 0  }
   0x8   :  { %s3601_s19 = smov 0   ;;  %s3603_s20 = smov 0  }
   0x9   :  { %s3605_s21 = smov 0   ;;  %s3607_s22 = smov 0  }
   0xa LB: > { %s5461_s23 = sadd.s32 4294967295, %s3550_s22   ;;  %s30_s24 = sadd.s32 1, %s3542_s20  ;;  %s3550_s22 = sphi %s3607_s22, %s21_s22   ;;  %s3546_s21 = sphi %s3605_s21, %s6029_s21   ;;  %s3542_s20 = sphi %s3603_s20, %s6028_s20   ;;  %s3538_s19 = sphi %s3601_s19, %s6027_s19   ;;  %s3534_s18 = sphi %s3599_s18, %s6026_s18   ;;  %s3530_s17 = sphi %s3597_s17, %s6025_s17   ;;  %s3526_s16 = sphi %s3595_s16, %s6024_s16   ;;  %s3522_s15 = sphi %s3593_s15, %s6023_s15  }
   0xb   : > { %p31_p0 = scmp.ge.s32.totalorder %s30_s24, 2  ;;  %s33_s25 = sadd.s32 1, %s3546_s21 }
   0xc   : > { %s37_s26 = ssub.s32 1, %s3546_s21  ;;  %s44_s27 = sadd.s32 1, %s3530_s17 }
   0xd   : > { %s6031_s24 = smov (%p31_p0, %s30_s24), 0  ;;  %s6033_s25 = smov (!%p31_p0, %s33_s25), %s3546_s21 }
   0xe   : > { %s3640_s28 = smul.u32 %s3542_s20, %s37_s26  ;;  %p51_p1 = scmp.ne.s32.totalorder %s3530_s17, %s3526_s16 }
   0xf   : > { %p35_p2 = scmp.ge.s32.totalorder %s6033_s25, 2  ;;  %p52_p3 = scmp.eq.s32.totalorder %s3550_s22, 0 }
  0x10   : > { %p57_p4 = scmp.ne.s32.totalorder %s3526_s16, %s3522_s15  ;;  %p58_p5 = scmp.eq.s32.totalorder %s5461_s23, 0 }
  0x11   : > { %s6035_s25 = smov (%p35_p2, %s6033_s25), 0  ;;  %p3650_p6 = por %p52_p3, %p51_p1 }
  0x12   : > { %5623 = sst [smem:[#allocation16_spill]] %s6035_s25  ;;  %p3654_p7 = por %p58_p5, %p57_p4 }
  0x13   : > { %s39_s5 = ssub.s32 1, %s6035_s25  ;;  %p3280_p8 = scmp.lt.s32.totalorder %s3550_s22, 4 }
  0x14   : > { %s5625_s30 = scalar_select %p3654_p7, 1, 0 }
  0x15   : > { %s40_s6 = smul.u32 %s39_s5, %s6031_s24  ;;  %s3662_s7 = sand.u32 1, %s3530_s17  }
  0x16   : > { %s2863_s8 = sshll.u32 %s3640_s28, 8  ;;  %s2618_s10 = sshll.u32 %s3662_s7, 6 }
  0x17   : > { %s41_s9 = ssub.s32 %s3640_s28, %s40_s6  ;;  %s5626_s0 = sld [smem:[#allocation98_spill]] }
  0x18   : > { %p42_p9 = scmp.eq.s32.totalorder %s41_s9, 0  ;;  %s188_s15 = scalar_lea.vmem [#allocation7], %s2618_s10 }
  0x19   : > { %s197_s26 = sshll.u32 %s188_s15, 4  ;;  %p3681_p10 = pnand %p3280_p8, %p3650_p6  ;;  %s3685_s26 = int_to_ptr.vmem [resolvable:$true] %s197_s26 }
  0x1a   : > { %s3675_s14 = scalar_select %p42_p9, %s3530_s17, %s44_s27  }
  0x1b   : > { %s185_s6 = scalar_lea.sflag [#allocation8], %s3662_s7  ;;  %p3392_p13 = pneg %p3681_p10 }
  0x1d   : > { %s3672_s13 = scalar_lea.hbm %s5626_s0, %s2863_s8  ;;  %s3395_s11 = scalar_lea.hbm %s5626_s0, 2048 }
  0x1e   : > { %s3390_s9 = scalar_lea.hbm %s3672_s13, 1024  ;;  %p3396_p2 = scmp.lt.u32.totalorder %s3672_s13, %s5626_s0 }
  0x1f   : > { %p3391_p12 = scmp.ne.s32.totalorder %s3672_s13, %s3390_s9  ;;  %p3397_p3 = scmp.lt.u32.totalorder %s3395_s11, %s3390_s9 }
  0x20   : > { %p3399_p5 = scmp.lt.u32.totalorder %s3390_s9, %s3672_s13 }
  0x21   : > { %p3393_p0 = pnand %p3392_p13, %p3391_p12  ;;  %p3398_p4 = por %p3397_p3, %p3396_p2 }
  0x23   : > { %p3394_p1 = pneg %p3393_p0  ;;  %p3400_p6 = por %p3399_p5, %p3398_p4 }
  0x25   : > { %p3401_p8 = pnand %p3400_p6, %p3394_p1 }
  0x27   : > { %3404 = shalt.err (!%p3401_p8)
}
  0x28   : > { %s3405_s23 = scalar_lea.vmem %s3685_s26, 1024  ;;  %s3552_s27 = smov [#allocation7]  }
  0x29   : > { %p3406_p9 = scmp.ne.s32.totalorder %s3685_s26, %s3405_s23  ;;  %s3410_s29 = sshll.u32 %s3552_s27, 4  ;;  %s3411_s29 = int_to_ptr.vmem [resolvable:$false] %s3410_s29 }
  0x2a   : > { %s3412_s12 = scalar_lea.vmem %s3411_s29, 2048  ;;  %p3413_p11 = scmp.lt.s32.totalorder %s3685_s26, %s3411_s29 }
  0x2b   : > { %p3408_p12 = pnand %p3406_p9, %p3392_p13  ;;  %p3414_p2 = scmp.lt.s32.totalorder %s3412_s12, %s3405_s23 }
  0x2d   : > { %p3409_p0 = pneg %p3408_p12  ;;  %p3415_p3 = por %p3414_p2, %p3413_p11 }
  0x2f   : > { %p3416_p4 = pnand %p3415_p3, %p3409_p0 }
  0x31   : > { %3419 = shalt.err (!%p3416_p4)
}
  0x32   : > { %s3553_s9 = smov 512   ;;  %s3554_s11 = smov 256  }
  0x33   : > { %s3555_s15 = smov 16   ;;  %p244_p11 = scmp.lt.s32.totalorder %s3550_s22, 5 }
  0x34   : > { %3276 = dma.hbm_to_vmem [thread:$0]  (!%p3681_p10), %s3672_s13, 1024, %s3685_s26, %s185_s6, %s3553_s9, %s3554_s11, %s3555_s15  }
  0x35   : > { %s3725_s29 = scalar_lea.hbm %s5457_s1, %s2863_s8  ;;  %p5628_p1 = scmp.ge.s32.totalorder %s3550_s22, 1 }
  0x36   : > { %s211_s0 = scalar_lea.vmem [#allocation10], %s2618_s10  ;;  %s208_s28 = scalar_lea.sflag [#allocation11], %s3662_s7 }
  0x37   : > { %p3729_p5 = pnand %p5628_p1, %p244_p11  ;;  %s220_s25 = sshll.u32 %s211_s0, 4  ;;  %s3735_s25 = int_to_ptr.vmem [resolvable:$true] %s220_s25 }
  0x38   : > { %s3420_s13 = scalar_lea.hbm %s3725_s29, 1024  ;;  %s3425_s6 = scalar_lea.hbm %s5457_s1, 2048 }
  0x39   : > { %p3421_p6 = scmp.ne.s32.totalorder %s3725_s29, %s3420_s13  ;;  %p3426_p12 = scmp.lt.u32.totalorder %s3725_s29, %s5457_s1 }
  0x3a   : > { %p3427_p0 = scmp.lt.u32.totalorder %s3425_s6, %s3420_s13  ;;  %p3429_p3 = scmp.lt.u32.totalorder %s3420_s13, %s3725_s29 }
  0x3b   : > { %p3423_p8 = pnand %p3421_p6, %p3392_p13 }
  0x3c   : > { %p3428_p2 = por %p3427_p0, %p3426_p12 }
  0x3d   : > { %p3424_p9 = pneg %p3423_p8 }
  0x3e   : > { %p3430_p4 = por %p3429_p3, %p3428_p2 }
  0x40   : > { %p3431_p11 = pnand %p3430_p4, %p3424_p9 }
  0x42   : > { %3434 = shalt.err (!%p3431_p11)
}
  0x43   : > { %s3435_s0 = scalar_lea.vmem %s3735_s25, 1024  ;;  %s3556_s10 = smov [#allocation10]  }
  0x44   : > { %p3436_p1 = scmp.ne.s32.totalorder %s3735_s25, %s3435_s0  ;;  %s3440_s8 = sshll.u32 %s3556_s10, 4  ;;  %s3441_s8 = int_to_ptr.vmem [resolvable:$false] %s3440_s8 }
  0x45   : > { %s3442_s26 = scalar_lea.vmem %s3441_s8, 2048  ;;  %p3443_p7 = scmp.lt.s32.totalorder %s3735_s25, %s3441_s8 }
  0x46   : > { %p3438_p6 = pnand %p3436_p1, %p3392_p13  ;;  %p3444_p12 = scmp.lt.s32.totalorder %s3442_s26, %s3435_s0 }
  0x48   : > { %p3439_p8 = pneg %p3438_p6  ;;  %p3445_p0 = por %p3444_p12, %p3443_p7 }
  0x4a   : > { %p3446_p2 = pnand %p3445_p0, %p3439_p8 }
  0x4c   : > { %3449 = shalt.err (!%p3446_p2)
}
  0x4d   : > { %3279 = dma.hbm_to_vmem [thread:$0]  (!%p3681_p10), %s3725_s29, 1024, %s3735_s25, %s208_s28, %s3553_s9, %s3554_s11, %s3555_s15  }
  0x4e   : > { %248 = sbr.rel (%p3729_p5) target bundleno = 1522 (0x5f2), region = 36 }
  0x55   : > { %s250_s13 = sand.u32 1, %s3526_s16   ;;  %p5630_p7 = scmp.ne.s32.totalorder %s5625_s30, 0 }
  0x56   : > { %s2625_s6 = sshll.u32 %s250_s13, 6  ;;  %s251_s23 = scalar_lea.sflag [#allocation8], %s250_s13 }
  0x57   : > { %s3769_s27 = scalar_lea.vmem [#allocation7], %s2625_s6 }
  0x58   : > { %3509 = dma.done.wait (%p5630_p7), %s251_s23, 1024  }
  0x59   : > { %3511 = vsyncadd (%p5630_p7), %s251_s23, 4294966272  ;;  %s260_s7 = scalar_lea.sflag [#allocation11], %s250_s13  ;;  %s3775_s5 = scalar_lea.vmem [#allocation10], %s2625_s6 }
  0x5a   : > { %3513 = dma.done.wait (%p5630_p7), %s260_s7, 1024  }
  0x5b   : > { %3515 = vsyncadd (%p5630_p7), %s260_s7, 4294966272  ;;  %s3782_s25 = sshll.u32 %s3534_s18, 1  ;;  %v5469_v0 = vlaneseq  ;;  %s2629_s9 = sshll.u32 %s3534_s18, 8  ;;  %v3557_v28 = vmov 0.0  }
  0x5c   : > { %p303_p10 = scmp.lt.s32.totalorder %s3782_s25, 3  ;;  %v318_v1 = vstv %s2629_s9  ;;  %p444_p13 = scmp.eq.s32.totalorder %s3538_s19, 0 }
  0x5d   : > { %v315_v2 = vand.u32 127, %v5469_v0  ;;  %p445_p5 = scmp.eq.s32.totalorder %s3534_s18, 0  ;;  %v3803_v5 = vshrl.u32 %v5469_v0, 7 }
  0x5e   : > { %s304_s11 = scalar_select %p303_p10, %s3782_s25, 3 }
  0x5f   : > { %v316_v3 = vadd.s32 128, %v315_v2  ;;  %v3790_v4 = vadd.s32 %v318_v1, %v315_v2  ;;  %p3792_p9 = pnand %p445_p5, %p444_p13  ;;  %5632 = vst [vmem:[#allocation17_spill] sm:$0xff] %v3803_v5  ;;  %v3812_v9 = vadd.s32 8, %v3803_v5  ;;  %v3815_v10 = vadd.s32 16, %v3803_v5 }
  0x60   : > { %s305_s12 = scalar_lea.vmem %s5458_s2, %s304_s11  ;;  %s310_s10 = scalar_lea.vmem %s5459_s3, %s304_s11  ;;  %v3818_v11 = vadd.s32 24, %v3803_v5  ;;  %v3821_v12 = vadd.s32 32, %v3803_v5  ;;  %v3824_v13 = vadd.s32 40, %v3803_v5  ;;  %v3827_v14 = vsub.s32 0, %v3803_v5 }
  0x61   : > { %v3805_v6 = vadd.s32 %v318_v1, %v316_v3  ;;  %v3808_v7 = vld [vmem:[%s310_s10] sm:$0x3]  ;;  %5634 = vst [vmem:[#allocation19_spill] sm:$0xff] %v3812_v9  ;;  %5635 = vst [vmem:[#allocation20_spill] sm:$0xff] %v3815_v10  ;;  %v3830_v15 = vsub.s32 1, %v3803_v5  ;;  %v3833_v16 = vadd.s32 48, %v3803_v5 }
  0x62   : > { %5633 = vst [vmem:[#allocation18_spill] sm:$0xff] %v3808_v7  ;;  %v312_v8 = vld [vmem:[%s305_s12] sm:$0x3]  ;;  %5636 = vst [vmem:[#allocation21_spill] sm:$0xff] %v3818_v11  ;;  %v3836_v17 = vadd.s32 56, %v3803_v5  ;;  %v3839_v18 = vadd.s32 64, %v3803_v5 }
  0x63   : > { %5637 = vst [vmem:[#allocation22_spill] sm:$0xff] %v3821_v12  ;;  %5638 = vst [vmem:[#allocation23_spill] sm:$0xff] %v3824_v13  ;;  %v3842_v19 = vadd.s32 72, %v3803_v5  ;;  %v3845_v20 = vadd.s32 80, %v3803_v5  ;;  %v3848_v21 = vadd.s32 88, %v3803_v5  ;;  %v3851_v22 = vrot.slane %v312_v8, %v3827_v14 }
  0x64   : > { %5639 = vst [vmem:[#allocation24_spill] sm:$0xff] %v3827_v14  ;;  %5640 = vst [vmem:[#allocation25_spill] sm:$0xff] %v3830_v15  ;;  %v3854_v23 = vrot.slane %v312_v8, %v3830_v15  ;;  %v3857_v24 = vadd.s32 96, %v3803_v5  ;;  %v3860_v25 = vadd.s32 104, %v3803_v5  ;;  %v3863_v26 = vadd.s32 112, %v3803_v5 }
  0x65   : > { %5641 = vst [vmem:[#allocation26_spill] sm:$0xff] %v3833_v16  ;;  %5642 = vst [vmem:[#allocation27_spill] sm:$0xff] %v3836_v17  ;;  %v3866_v27 = vadd.s32 120, %v3803_v5  ;;  %vm5520_vm2 = vcmp.eq.s32.totalorder %v3803_v5, %v3851_v22  ;;  %vm5515_vm4 = vcmp.eq.s32.totalorder %v3812_v9, %v3851_v22  ;;  %vm5464_vm6 = vcmp.eq.s32.totalorder %v3815_v10, %v3851_v22 }
  0x66   : > { %5643 = vst [vmem:[#allocation28_spill] sm:$0xff] %v3839_v18  ;;  %5644 = vst [vmem:[#allocation29_spill] sm:$0xff] %v3842_v19  ;;  %vm5532_vm3 = vcmp.eq.s32.totalorder %v3803_v5, %v3854_v23  ;;  %vm5521_vm5 = vcmp.eq.s32.totalorder %v3812_v9, %v3854_v23  ;;  %vm5465_vm7 = vcmp.eq.s32.totalorder %v3815_v10, %v3854_v23  ;;  %v3935_v29 = vsel %vm5520_vm2, 1.0, %v3557_v28 }
  0x67   : > { %5645 = vst [vmem:[#allocation30_spill] sm:$0xff] %v3845_v20  ;;  %5646 = vst [vmem:[#allocation31_spill] sm:$0xff] %v3848_v21  ;;  %vm5466_vm8 = vcmp.eq.s32.totalorder %v3818_v11, %v3851_v22  ;;  %vm5467_vm9 = vcmp.eq.s32.totalorder %v3818_v11, %v3854_v23  ;;  %vm5468_vm10 = vcmp.eq.s32.totalorder %v3821_v12, %v3851_v22  ;;  %v3940_v30 = vsel %vm5532_vm3, 1.0, %v3557_v28 }
  0x68   : > { %5647 = vst [vmem:[#allocation32_spill] sm:$0xff] %v3851_v22  ;;  %5648 = vst [vmem:[#allocation33_spill] sm:$0xff] %v3854_v23  ;;  %vm5573_vm13 = vcmp.eq.s32.totalorder %v3857_v24, %v3854_v23  ;;  %vm5557_vm14 = vcmp.eq.s32.totalorder %v3860_v25, %v3851_v22  ;;  %vm5569_vm15 = vcmp.eq.s32.totalorder %v3860_v25, %v3854_v23  ;;  %v3945_v31 = vsel %vm5515_vm4, 1.0, %v3557_v28 }
  0x69   : > { %5649 = vst [vmem:[#allocation34_spill] sm:$0xff] %v3857_v24  ;;  %5650 = vst [vmem:[#allocation35_spill] sm:$0xff] %v3860_v25  ;;  %vm5513_vm1 = vcmp.eq.s32.totalorder %v3863_v26, %v3851_v22  ;;  %vm5533_vm0 = vcmp.eq.s32.totalorder %v3863_v26, %v3854_v23  ;;  %vm5512_vm11 = vcmp.eq.s32.totalorder %v3866_v27, %v3851_v22  ;;  %v3950_v32 = vsel %vm5521_vm5, 1.0, %v3557_v28 }
  0x6a   : > { %5651 = vst [vmem:[#allocation36_spill] sm:$0xff] %v3863_v26  ;;  %5652 = vst [vmem:[#allocation37_spill] sm:$0xff] %v3866_v27  ;;  %vm5514_vm12 = vcmp.eq.s32.totalorder %v3866_v27, %v3854_v23  ;;  %v3955_v33 = vsel %vm5464_vm6, 1.0, %v3557_v28  ;;  %v3960_v34 = vsel %vm5465_vm7, 1.0, %v3557_v28  ;;  %v3965_v35 = vsel %vm5466_vm8, 1.0, %v3557_v28 }
  0x6b   : > { %5653 = vst [vmem:[#allocation38_spill] sm:$0xff] %v3935_v29  ;;  %5654 = vst [vmem:[#allocation39_spill] sm:$0xff] %v3940_v30  ;;  %v3970_v36 = vsel %vm5467_vm9, 1.0, %v3557_v28  ;;  %v3975_v37 = vsel %vm5468_vm10, 1.0, %v3557_v28  ;;  %vm5662_vm6 = vcmp.eq.s32.totalorder %v3821_v12, %v3854_v23  ;;  %vm5664_vm7 = vcmp.eq.s32.totalorder %v3824_v13, %v3851_v22 }
  0x6c   : > { %5655 = vst [vmem:[#allocation40_spill] sm:$0xff] %v3945_v31  ;;  %5656 = vst [vmem:[#allocation41_spill] sm:$0xff] %v3950_v32  ;;  %v3980_v38 = vsel %vm5662_vm6, 1.0, %v3557_v28  ;;  %v3985_v39 = vsel %vm5664_vm7, 1.0, %v3557_v28  ;;  %vm5666_vm8 = vcmp.eq.s32.totalorder %v3824_v13, %v3854_v23  ;;  %vm5668_vm9 = vcmp.eq.s32.totalorder %v3833_v16, %v3851_v22 }
  0x6d   : > { %5657 = vst [vmem:[#allocation42_spill] sm:$0xff] %v3955_v33  ;;  %5658 = vst [vmem:[#allocation43_spill] sm:$0xff] %v3960_v34  ;;  %v3990_v40 = vsel %vm5666_vm8, 1.0, %v3557_v28  ;;  %v3995_v41 = vsel %vm5668_vm9, 1.0, %v3557_v28  ;;  %vm5670_vm10 = vcmp.eq.s32.totalorder %v3833_v16, %v3854_v23  ;;  %vm5672_vm6 = vcmp.eq.s32.totalorder %v3836_v17, %v3851_v22 }
  0x6e   : > { %5659 = vst [vmem:[#allocation44_spill] sm:$0xff] %v3965_v35  ;;  %5660 = vst [vmem:[#allocation45_spill] sm:$0xff] %v3970_v36  ;;  %v4000_v42 = vsel %vm5670_vm10, 1.0, %v3557_v28  ;;  %v4005_v43 = vsel %vm5672_vm6, 1.0, %v3557_v28  ;;  %vm5674_vm7 = vcmp.eq.s32.totalorder %v3836_v17, %v3854_v23  ;;  %vm5676_vm8 = vcmp.eq.s32.totalorder %v3839_v18, %v3851_v22 }
  0x6f   : > { %5661 = vst [vmem:[#allocation46_spill] sm:$0xff] %v3975_v37  ;;  %5663 = vst [vmem:[#allocation47_spill] sm:$0xff] %v3980_v38  ;;  %v4010_v44 = vsel %vm5674_vm7, 1.0, %v3557_v28  ;;  %v4015_v45 = vsel %vm5676_vm8, 1.0, %v3557_v28  ;;  %vm5678_vm9 = vcmp.eq.s32.totalorder %v3839_v18, %v3854_v23  ;;  %vm5680_vm10 = vcmp.eq.s32.totalorder %v3842_v19, %v3851_v22 }
  0x70   : > { %5665 = vst [vmem:[#allocation48_spill] sm:$0xff] %v3985_v39  ;;  %5667 = vst [vmem:[#allocation49_spill] sm:$0xff] %v3990_v40  ;;  %v4020_v46 = vsel %vm5678_vm9, 1.0, %v3557_v28  ;;  %v4025_v47 = vsel %vm5680_vm10, 1.0, %v3557_v28  ;;  %vm5682_vm6 = vcmp.eq.s32.totalorder %v3842_v19, %v3854_v23  ;;  %vm5684_vm7 = vcmp.eq.s32.totalorder %v3845_v20, %v3851_v22 }
  0x71   : > { %5669 = vst [vmem:[#allocation50_spill] sm:$0xff] %v3995_v41  ;;  %5671 = vst [vmem:[#allocation51_spill] sm:$0xff] %v4000_v42  ;;  %v4030_v48 = vsel %vm5682_vm6, 1.0, %v3557_v28  ;;  %v4035_v49 = vsel %vm5684_vm7, 1.0, %v3557_v28  ;;  %vm5686_vm8 = vcmp.eq.s32.totalorder %v3845_v20, %v3854_v23  ;;  %vm5688_vm9 = vcmp.eq.s32.totalorder %v3848_v21, %v3851_v22 }
  0x72   : > { %5673 = vst [vmem:[#allocation52_spill] sm:$0xff] %v4005_v43  ;;  %5675 = vst [vmem:[#allocation53_spill] sm:$0xff] %v4010_v44  ;;  %v4040_v50 = vsel %vm5686_vm8, 1.0, %v3557_v28  ;;  %v4045_v51 = vsel %vm5688_vm9, 1.0, %v3557_v28  ;;  %vm5690_vm10 = vcmp.eq.s32.totalorder %v3848_v21, %v3854_v23  ;;  %vm5692_vm6 = vcmp.eq.s32.totalorder %v3857_v24, %v3851_v22 }
  0x73   : > { %5677 = vst [vmem:[#allocation54_spill] sm:$0xff] %v4015_v45  ;;  %5679 = vst [vmem:[#allocation55_spill] sm:$0xff] %v4020_v46  ;;  %v4050_v52 = vsel %vm5690_vm10, 1.0, %v3557_v28  ;;  %v4055_v53 = vsel %vm5692_vm6, 1.0, %v3557_v28  ;;  %v4060_v54 = vsel %vm5573_vm13, 1.0, %v3557_v28  ;;  %v4065_v55 = vsel %vm5557_vm14, 1.0, %v3557_v28 }
  0x74   : > { %5681 = vst [vmem:[#allocation56_spill] sm:$0xff] %v4025_v47  ;;  %5683 = vst [vmem:[#allocation57_spill] sm:$0xff] %v4030_v48  ;;  %v4070_v56 = vsel %vm5569_vm15, 1.0, %v3557_v28  ;;  %v4075_v57 = vsel %vm5513_vm1, 1.0, %v3557_v28  ;;  %v4080_v58 = vsel %vm5533_vm0, 1.0, %v3557_v28  ;;  %v4085_v59 = vsel %vm5512_vm11, 1.0, %v3557_v28 }
  0x75   : > { %5685 = vst [vmem:[#allocation58_spill] sm:$0xff] %v4035_v49  ;;  %5687 = vst [vmem:[#allocation59_spill] sm:$0xff] %v4040_v50  ;;  %v4090_v60 = vsel %vm5514_vm12, 1.0, %v3557_v28  ;;  %449 = sbr.rel (%p3792_p9) target bundleno = 125 (0x7d), region = 48  ;;  %vm450_vm7 = vcmask (!%p3792_p9), 0   ;;  %v3559_v62 = vmov (!%p3792_p9), 0.0  }
  0x76   : > { %5689 = vst [vmem:[#allocation60_spill] sm:$0xff] %v4045_v51  ;;  %5691 = vst [vmem:[#allocation61_spill] sm:$0xff] %v4050_v52  ;;  %v3558_v61 = vmov (!%p3792_p9), -1e+30  }
  0x77   : > { %5693 = vst [vmem:[#allocation62_spill] sm:$0xff] %v4055_v53  ;;  %5694 = vst [vmem:[#allocation63_spill] sm:$0xff] %v4060_v54 }
  0x78   : > { %5695 = vst [vmem:[#allocation64_spill] sm:$0xff] %v4065_v55  ;;  %5696 = vst [vmem:[#allocation65_spill] sm:$0xff] %v4070_v56 }
  0x79   : > { %5697 = vst [vmem:[#allocation66_spill] sm:$0xff] %v4075_v57  ;;  %5698 = vst [vmem:[#allocation67_spill] sm:$0xff] %v4080_v58 }
  0x7a   : > { %5699 = vst [vmem:[#allocation68_spill] sm:$0xff] %v4085_v59  ;;  %5700 = vst [vmem:[#allocation69_spill] sm:$0xff] %v4090_v60 }
  0x7b   : > { %451 = vst.msk [vmem:[#allocation3] sm:$0x1] (!%p3792_p9), %vm450_vm7, %v3558_v61  ;;  %452 = vst [vmem:[#allocation4] sm:$0x1] (!%p3792_p9), %v3559_v62 }
  0x7c   : > { %453 = vst.msk [vmem:[#allocation5] sm:$0x1] %vm450_vm7, %v3559_v62  ;;  %454 = vst.msk [vmem:[#allocation6] sm:$0x1] %vm450_vm7, %v3559_v62 }
  0x7d PF: > { %p2662_p3 = scmp.ne.s32.totalorder %s3538_s19, 0 }
  0x7f   : > { %457 = sbr.rel (%p2662_p3) target bundleno = 897 (0x381), region = 52 }
  0x86   : > { %v458_v63 = vld [vmem:[%s3769_s27] sm:$0xff]  ;;  %v459_v1 = vld [vmem:[%s3769_s27 + $0x8] sm:$0xff]  ;;  %v460_v2 = vld [vmem:[%s3769_s27 + $0x10] sm:$0xff]  ;;  %s611_s8 = scalar_lea.vmem [#allocation2], %s3782_s25 }
  0x87   : > { %v461_v3 = vld [vmem:[%s3769_s27 + $0x18] sm:$0xff]  ;;  %v462_v8 = vld [vmem:[%s3769_s27 + $0x20] sm:$0xff]  ;;  %v4101_v28 = vld [vmem:[%s3769_s27 + $0x28] sm:$0xff]  ;;  %v500_v61 = vmul.f32 %v458_v63, %v458_v63  ;;  %v501_v62 = vmul.f32 %v459_v1, %v459_v1  ;;  %v502_v0 = vmul.f32 %v460_v2, %v460_v2 }
  0x88   : > { %v4104_v15 = vld [vmem:[%s3769_s27 + $0x30] sm:$0xff]  ;;  %v4107_v7 = vld [vmem:[%s3769_s27 + $0x38] sm:$0xff]  ;;  %v503_v14 = vmul.f32 %v461_v3, %v461_v3  ;;  %v504_v27 = vmul.f32 %v462_v8, %v462_v8  ;;  %v505_v26 = vmul.f32 %v4101_v28, %v4101_v28  ;;  %v466_v59 = vld [vmem:[%s3775_s5] sm:$0xff] }
  0x89   : > { %v506_v25 = vmul.f32 %v4104_v15, %v4104_v15  ;;  %v508_v24 = vadd.f32 %v502_v0, %v500_v61  ;;  %v467_v57 = vld [vmem:[%s3775_s5 + $0x8] sm:$0xff]  ;;  %v468_v21 = vld [vmem:[%s3775_s5 + $0x10] sm:$0xff]  ;;  %v507_v20 = vmul.f32 %v4107_v7, %v4107_v7  ;;  %v469_v58 = vld [vmem:[%s3775_s5 + $0x18] sm:$0xff]  ;;  %v540_v19 = vmul.f32 %v466_v59, %v466_v59 }
  0x8a   : > { %v517_v60 = vadd.f32 %v503_v14, %v501_v62  ;;  %v470_v53 = vld [vmem:[%s3775_s5 + $0x20] sm:$0xff]  ;;  %v471_v56 = vld [vmem:[%s3775_s5 + $0x28] sm:$0xff]  ;;  %v472_v51 = vld [vmem:[%s3775_s5 + $0x30] sm:$0xff]  ;;  %v541_v18 = vmul.f32 %v467_v57, %v467_v57  ;;  %v542_v52 = vmul.f32 %v468_v21, %v468_v21  ;;  %v543_v61 = vmul.f32 %v469_v58, %v469_v58 }
  0x8b   : > { %v509_v55 = vadd.f32 %v508_v24, %v504_v27  ;;  %v473_v50 = vld [vmem:[%s3775_s5 + $0x38] sm:$0xff]  ;;  %v544_v45 = vmul.f32 %v470_v53, %v470_v53  ;;  %v545_v48 = vmul.f32 %v471_v56, %v471_v56  ;;  %v546_v16 = vmul.f32 %v472_v51, %v472_v51 }
  0x8c   : > { %v518_v54 = vadd.f32 %v517_v60, %v505_v26  ;;  %v547_v14 = vmul.f32 %v473_v50, %v473_v50  ;;  %v548_v62 = vadd.f32 %v542_v52, %v540_v19  ;;  %v557_v24 = vadd.f32 %v543_v61, %v541_v18 }
  0x8d   : > { %v510_v49 = vadd.f32 %v509_v55, %v506_v25  ;;  %v474_v12 = vmul.f32 %v466_v59, %v458_v63  ;;  %v476_v37 = vmul.f32 %v468_v21, %v460_v2  ;;  %v475_v19 = vmul.f32 %v467_v57, %v459_v1 }
  0x8e   : > { %v519_v0 = vadd.f32 %v518_v54, %v507_v20  ;;  %v549_v26 = vadd.f32 %v548_v62, %v544_v45  ;;  %v558_v60 = vadd.f32 %v557_v24, %v545_v48  ;;  %v477_v18 = vmul.f32 %v469_v58, %v461_v3 }
  0x8f   : > { %v511_v47 = vrot.slane %v510_v49, 4  ;;  %v478_v52 = vmul.f32 %v470_v53, %v462_v8  ;;  %v482_v45 = vadd.f32 %v476_v37, %v474_v12  ;;  %v480_v59 = vmul.f32 %v472_v51, %v4104_v15 }
  0x90   : > { %v520_v17 = vrot.slane %v519_v0, 4  ;;  %v550_v41 = vadd.f32 %v549_v26, %v546_v16  ;;  %v559_v44 = vadd.f32 %v558_v60, %v547_v14  ;;  %v479_v16 = vmul.f32 %v471_v56, %v4101_v28 }
  0x91   : > { %v512_v46 = vadd.f32 %v511_v47, %v510_v49  ;;  %v483_v21 = vadd.f32 %v482_v45, %v478_v52 }
  0x92   : > { %v521_v27 = vadd.f32 %v520_v17, %v519_v0  ;;  %v551_v54 = vrot.slane %v550_v41, 4  ;;  %v560_v13 = vrot.slane %v559_v44, 4 }
  0x93   : > { %v513_v43 = vrot.slane %v512_v46, 2  ;;  %v484_v12 = vadd.f32 %v483_v21, %v480_v59 }
  0x94   : > { %v522_v25 = vrot.slane %v521_v27, 2  ;;  %v552_v47 = vadd.f32 %v551_v54, %v550_v41  ;;  %v561_v49 = vadd.f32 %v560_v13, %v559_v44  ;;  %v481_v13 = vmul.f32 %v473_v50, %v4107_v7 }
  0x95   : > { %v514_v55 = vadd.f32 %v513_v43, %v512_v46  ;;  %v491_v46 = vadd.f32 %v477_v18, %v475_v19  ;;  %v485_v57 = vrot.slane %v484_v12, 4 }
  0x96   : > { %v523_v42 = vadd.f32 %v522_v25, %v521_v27  ;;  %v553_v48 = vrot.slane %v552_v47, 2  ;;  %v562_v43 = vrot.slane %v561_v49, 2 }
  0x97   : > { %v515_v20 = vrot.slane %v514_v55, 1  ;;  %v492_v44 = vadd.f32 %v491_v46, %v479_v16  ;;  %v486_v15 = vadd.f32 %v485_v57, %v484_v12 }
  0x98   : > { %v524_v39 = vrot.slane %v523_v42, 1  ;;  %v554_v0 = vadd.f32 %v553_v48, %v552_v47  ;;  %v563_v61 = vadd.f32 %v562_v43, %v561_v49 }
  0x99   : > { %v516_v40 = vadd.f32 %v515_v20, %v514_v55  ;;  %v493_v37 = vadd.f32 %v492_v44, %v481_v13  ;;  %v487_v20 = vrot.slane %v486_v15, 2 }
  0x9a   : > { %v525_v17 = vadd.f32 %v524_v39, %v523_v42  ;;  %v555_v63 = vrot.slane %v554_v0, 1  ;;  %v564_v41 = vrot.slane %v563_v61, 1 }
  0x9b   : > { %3363 = vrsqrt.f32 %v516_v40  ;;  %v494_v58 = vrot.slane %v493_v37, 4  ;;  %vm528_vm8 = vcmp.eq.f32.partialorder %v516_v40, inf  ;;  %v531_v51 = vand.u32 2147483648, %v516_v40 }
  0x9c   : > { %3365 = vrsqrt.f32 %v525_v17  ;;  %v556_v39 = vadd.f32 %v555_v63, %v554_v0  ;;  %v565_v42 = vadd.f32 %v564_v41, %v563_v61  ;;  %vm535_vm9 = vcmp.eq.f32.partialorder %v525_v17, inf }
  0x9d   : > { %v495_v3 = vadd.f32 %v494_v58, %v493_v37  ;;  %vm530_vm10 = vcmp.eq.f32.partialorder %v516_v40, 0.0  ;;  %v538_v7 = vand.u32 2147483648, %v525_v17  ;;  %vm537_vm6 = vcmp.eq.f32.partialorder %v525_v17, 0.0 }
  0x9e   : > { %3367 = vrsqrt.f32 %v556_v39  ;;  %vm568_vm7 = vcmp.eq.f32.partialorder %v556_v39, inf  ;;  %v571_v14 = vand.u32 2147483648, %v556_v39  ;;  %vm570_vm11 = vcmp.eq.f32.partialorder %v556_v39, 0.0 }
  0x9f   : > { %3369 = vrsqrt.f32 %v565_v42  ;;  %vm575_vm1 = vcmp.eq.f32.partialorder %v565_v42, inf  ;;  %v578_v27 = vand.u32 2147483648, %v565_v42  ;;  %vm577_vm12 = vcmp.eq.f32.partialorder %v565_v42, 0.0 }
  0xa0   : > { %v488_v52 = vadd.f32 %v487_v20, %v486_v15  ;;  %v3560_v0 = vmov 1966171168   ;;  %v4147_v15 = vsub.f32 %v3950_v32, %v3950_v32 }
  0xa1   : > { %v596_v61 = vunpack.c.l.s4 %v3560_v0 }
  0xa2   : > { %v489_v43 = vrot.slane %v488_v52, 1  ;;  %5705 = vst [vmem:[#allocation71_spill] sm:$0xff] %v4147_v15 }
  0xa3   : > { %v597_v13 = vunpack.c.0.s8 %v596_v61 }
  0xa4   : > { %v490_v46 = vadd.f32 %v489_v43, %v488_v52 }
  0xa5   : > { %v3364_v53 = vpop.eup %3363  ;;  %v600_v37 = vsub.s32 %v597_v13, %v3803_v5  ;;  %v4246_v13 = vsub.f32 %v3980_v38, %v3980_v38 }
  0xa6   : > { %v3366_v56 = vpop.eup %3365  ;;  %v527_v1 = vmul.f32 %v3364_v53, %v516_v40 }
  0xa7   : > { %v534_v2 = vmul.f32 %v3366_v56, %v525_v17 }
  0xa8   : > { %v529_v8 = vsel %vm528_vm8, %v516_v40, %v527_v1  ;;  %v3368_v50 = vpop.eup %3367  ;;  %v496_v40 = vrot.slane %v495_v3, 2  ;;  %v5703_v1 = vlaneseq  ;;  %vm4163_vm8 = vmpackc.low %vm5521_vm5, %vm5532_vm3 }
  0xa9   : > { %v536_v28 = vsel %vm535_vm9, %v525_v17, %v534_v2  ;;  %v3370_v62 = vpop.eup %3369  ;;  %v567_v24 = vmul.f32 %v3368_v50, %v556_v39  ;;  %v532_v26 = vsel %vm530_vm10, %v531_v51, %v529_v8  ;;  %v4151_v51 = vsub.f32 %v3935_v29, %v3935_v29  ;;  %vm4181_vm9 = vmpackc.low %vm5515_vm4, %vm5520_vm2 }
  0xaa   : > { %v574_v60 = vmul.f32 %v3370_v62, %v565_v42  ;;  %v539_v25 = vsel %vm537_vm6, %v538_v7, %v536_v28  ;;  %v497_v48 = vadd.f32 %v496_v40, %v495_v3  ;;  %v4155_v3 = vsub.f32 %v3945_v31, %v3945_v31 }
  0xab   : > { %v569_v55 = vsel %vm568_vm7, %v556_v39, %v567_v24  ;;  %v4169_v7 = vsub.f32 %v3960_v34, %v3960_v34  ;;  %v4173_v50 = vsub.f32 %v3970_v36, %v3970_v36  ;;  %v5536_v24 = vand.u32 4294901760, %v4147_v15 }
  0xac   : > { %v572_v54 = vsel %vm570_vm11, %v571_v14, %v569_v55  ;;  %v576_v47 = vsel %vm575_vm1, %v565_v42, %v574_v60  ;;  %v498_v16 = vrot.slane %v497_v48, 1  ;;  %vm5701_vm1 = vcmp.lt.s32.totalorder %v3790_v4, 512 }
  0xad   : > { %v579_v49 = vsel %vm577_vm12, %v578_v27, %v576_v47  ;;  %v580_v19 = vmul.f32 %v572_v54, %v532_v26  ;;  %vm5702_vm11 = vcmp.lt.s32.totalorder %v3805_v6, 512  ;;  %vm614_vm12 = vcmp.lt.s32.totalorder %v5703_v1, 256 }
  0xae   : > { %v581_v18 = vmul.f32 %v579_v49, %v539_v25  ;;  %v499_v59 = vadd.f32 %v498_v16, %v497_v48  ;;  %v3561_v4 = vmov 0   ;;  %v4143_v6 = vsub.f32 %v3940_v30, %v3940_v30 }
  0xaf   : > { %v582_v17 = vmax.f32 %v580_v19, 1e-08  ;;  %3361 = vset.pattern.permute.xlu0 %v3561_v4  ;;  %3362 = vset.pattern.permute.xlu1 %v3561_v4  ;;  %v4187_v14 = vsub.f32 %v3955_v33, %v3955_v33  ;;  %v5535_v27 = vand.u32 4294901760, %v4151_v51  ;;  %v5528_v26 = vand.u32 4294901760, %v4155_v3  ;;  %v5723_v4 = vld [vmem:[#allocation23_spill] sm:$0xff] }
  0xb0   : > { %v583_v45 = vmax.f32 %v581_v18, 1e-08  ;;  %5704 = vst [vmem:[#allocation70_spill] sm:$0xff] %v4143_v6  ;;  %v5537_v62 = vand.u32 4294901760, %v4143_v6  ;;  %v5539_v60 = vmov 1.0|1.0   ;;  %vm5710_vm10 = vcmp.eq.s32.totalorder %v3815_v10, %v3854_v23 }
  0xb1   : > { %3371 = vrcp.f32 %v582_v17  ;;  %2866 = vmatprep.subr.msk.bf16.mxu0 %vm4163_vm8, %v5539_v60  ;;  %vm5711_vm6 = vcmp.eq.s32.totalorder %v3818_v11, %v3854_v23  ;;  %v5527_v55 = vand.u32 4294901760, %v4169_v7  ;;  %v5526_v20 = vand.u32 4294901760, %v4173_v50 }
  0xb2   : > { %3373 = vrcp.f32 %v583_v45  ;;  %vm4202_vm7 = vmpackc.low %vm5711_vm6, %vm5710_vm10  ;;  %2868 = vmatpush1.bf16.xpose.msk.msra.mxu0 %vm4181_vm9, %v5539_v60  ;;  %v5525_v54 = vand.u32 4294901760, %v4187_v14  ;;  %v4214_v47 = vsub.f32 %v3965_v35, %v3965_v35  ;;  %v771_v40 = vsub.f32 %v4143_v6, %v5537_v62 }
  0xb3   : > { %v783_v49 = vsub.f32 %v4147_v15, %v5536_v24  ;;  %v777_v19 = vsub.f32 %v4151_v51, %v5535_v27  ;;  %v789_v18 = vsub.f32 %v4155_v3, %v5528_v26  ;;  %2870 = vmatprep.subr.msk.bf16.mxu0 %vm4202_vm7, %v5539_v60  ;;  %v795_v17 = vsub.f32 %v4169_v7, %v5527_v55  ;;  %v5744_v55 = vld [vmem:[#allocation56_spill] sm:$0xff] }
  0xb4   : > { %v807_v52 = vsub.f32 %v4173_v50, %v5526_v20  ;;  %v5524_v45 = vand.u32 4294901760, %v4214_v47  ;;  %v772_v48 = vand.u32 4294901760, %v771_v40  ;;  %vm5724_vm6 = vcmp.eq.s32.totalorder %v5723_v4, %v3854_v23  ;;  %v5743_v20 = vld [vmem:[#allocation54_spill] sm:$0xff] }
  0xb5   : > { %v784_v43 = vand.u32 4294901760, %v783_v49  ;;  %v778_v16 = vand.u32 4294901760, %v777_v19  ;;  %v796_v0 = vand.u32 4294901760, %v795_v17  ;;  %v5517_v49 = vand.u32 4294901760, %v4246_v13 }
  0xb6   : > { %v808_v61 = vand.u32 4294901760, %v807_v52  ;;  %v5728_v52 = vld [vmem:[#allocation53_spill] sm:$0xff]  ;;  %v4376_v26 = vsub.f32 %v5744_v55, %v5744_v55  ;;  %v5749_v55 = vld [vmem:[#allocation59_spill] sm:$0xff]  ;;  %v5818_v8 = vand.u32 4294901760, %v4151_v51 }
  0xbb   : > { %v3372_v21 = vpop.eup %3371 }
  0xbc   : > { %v3374_v63 = vpop.eup %3373  ;;  %v585_v41 = vmul.f32 %v3372_v21, %v490_v46  ;;  %v790_v46 = vand.u32 4294901760, %v789_v18  ;;  %v813_v21 = vsub.f32 %v4214_v47, %v5524_v45  ;;  %v5727_v18 = vld [vmem:[#allocation51_spill] sm:$0xff] }
  0xbd   : > { %v587_v44 = vmul.f32 %v3374_v63, %v499_v59  ;;  %v801_v59 = vsub.f32 %v4187_v14, %v5525_v54  ;;  %v2897_v63 = vpack.c.bf16 %v784_v43, %v772_v48  ;;  %v4284_v17 = vsub.f32 %v5727_v18, %v5727_v18 }
  0xbe   : > { %v588_v39 = vmul.f32 10.0, %v585_v41  ;;  %v2899_v41 = vpack.c.bf16 %v790_v46, %v778_v16  ;;  %v4288_v48 = vsub.f32 %v5728_v52, %v5728_v52  ;;  %v814_v16 = vand.u32 4294901760, %v813_v21 }
  0xbf   : > { %v589_v42 = vmul.f32 10.0, %v587_v44  ;;  %v5714_v44 = vld [vmem:[#allocation49_spill] sm:$0xff]  ;;  %2898 = vmatprep.subr.bf16.mxu1 %v2897_v63  ;;  %v802_v43 = vand.u32 4294901760, %v801_v59  ;;  %v5518_v59 = vand.u32 4294901760, %v4284_v17 }
  0xc0   : > { %v4128_v12 = vsel %vm5701_vm1, %v588_v39, -1e+30  ;;  %v4250_v39 = vsub.f32 %v5714_v44, %v5714_v44  ;;  %vm5715_vm1 = vcmp.eq.s32.totalorder %v3815_v10, %v3851_v22  ;;  %2900 = vmatpush1.bf16.xpose.msra.mxu1 %v2899_v41  ;;  %v5519_v21 = vand.u32 4294901760, %v4288_v48  ;;  %v5729_v41 = vld [vmem:[#allocation50_spill] sm:$0xff] }
  0xc1   : > { %v4133_v53 = vsel %vm5702_vm11, %v589_v42, -1e+30  ;;  %vm5716_vm11 = vcmp.eq.s32.totalorder %v3818_v11, %v3851_v22  ;;  %v4308_v44 = vsub.f32 %v5729_v41, %v5729_v41  ;;  %v2903_v52 = vpack.c.bf16 %v814_v16, %v802_v43  ;;  %v5735_v16 = vld [vmem:[#allocation55_spill] sm:$0xff] }
  0xc2   : > { %v618_v56 = vmax.f32 %v4128_v12, %v4133_v53  ;;  %v594_v57 = vcombine.low %v4128_v12, %v4133_v53  ;;  %v5516_v19 = vand.u32 4294901760, %v4250_v39  ;;  %v855_v41 = vsub.f32 %v4288_v48, %v5519_v21  ;;  %v5736_v21 = vld [vmem:[#allocation26_spill] sm:$0xff]  ;;  %v5776_v11 = vld [vmem:[#allocation31_spill] sm:$0xff] }
  0xc3   : > { %v5825_v28 = vand.u32 4294901760, %v4250_v39 }
  0xc4   : > { %619 = vmax.xlane.f32.xlu0 %v618_v56  ;;  %v601_v58 = vrot.slane %v594_v57, %v600_v37  ;;  %v5719_v56 = vld [vmem:[#allocation46_spill] sm:$0xff]  ;;  %v831_v63 = vsub.f32 %v4250_v39, %v5516_v19  ;;  %v843_v19 = vsub.f32 %v4284_v17, %v5518_v59  ;;  %v4338_v59 = vsub.f32 %v5735_v16, %v5735_v16 }
  0xc5   : > { %v4264_v57 = vsub.f32 %v5719_v56, %v5719_v56  ;;  %v856_v45 = vand.u32 4294901760, %v855_v41 }
  0xc6   : > { %v608_v2 = vrot.slane %v601_v58, %v600_v37  ;;  %v2901_v37 = vpack.c.bf16 %v808_v61, %v796_v0  ;;  %v5720_v58 = vld [vmem:[#allocation48_spill] sm:$0xff]  ;;  %v819_v61 = vsub.f32 %v4246_v13, %v5517_v49  ;;  %v832_v56 = vand.u32 4294901760, %v831_v63 }
  0xc7   : > { %v4268_v1 = vsub.f32 %v5720_v58, %v5720_v58  ;;  %v5523_v46 = vand.u32 4294901760, %v4264_v57  ;;  %v5730_v49 = vld [vmem:[#allocation52_spill] sm:$0xff]  ;;  %v844_v16 = vand.u32 4294901760, %v843_v19 }
  0xc8   : > { %616 = vst.msk [vmem:[%s611_s8] sm:$0x3] %vm614_vm12, %v608_v2  ;;  %vm4258_vm12 = vmpackc.low %vm5716_vm11, %vm5715_vm1  ;;  %v5721_v2 = vld [vmem:[#allocation22_spill] sm:$0xff]  ;;  %2902 = vmatprep.subr.bf16.mxu1 %v2901_v37  ;;  %v820_v37 = vand.u32 4294901760, %v819_v61  ;;  %v4324_v61 = vsub.f32 %v5730_v49, %v5730_v49  ;;  %vm5732_vm11 = vcmp.eq.s32.totalorder %v5723_v4, %v3851_v22  ;;  %v5738_v49 = vld [vmem:[#allocation27_spill] sm:$0xff] }
  0xc9   : > { %vm5722_vm10 = vcmp.eq.s32.totalorder %v5721_v2, %v3854_v23  ;;  %2872 = vmatpush1.bf16.xpose.msk.msra.mxu0 %vm4258_vm12, %v5539_v60  ;;  %v5522_v0 = vand.u32 4294901760, %v4268_v1  ;;  %v825_v58 = vsub.f32 %v4264_v57, %v5523_v46  ;;  %vm5731_vm1 = vcmp.eq.s32.totalorder %v5721_v2, %v3851_v22  ;;  %v5742_v2 = vld [vmem:[#allocation57_spill] sm:$0xff]  ;;  %2904 = vmatpush1.bf16.xpose.msra.mxu1 %v2903_v52 }
  0xca   : > { %vm4276_vm4 = vmpackc.low %vm5724_vm6, %vm5722_vm10  ;;  %v2905_v63 = vpack.c.bf16 %v832_v56, %v820_v37  ;;  %vm5737_vm6 = vcmp.eq.s32.totalorder %v5736_v21, %v3854_v23  ;;  %vm5739_vm2 = vcmp.eq.s32.totalorder %v5738_v49, %v3854_v23  ;;  %v4352_v4 = vsub.f32 %v5742_v2, %v5742_v2 }
  0xcb   : > { %2874 = vmatprep.subr.msk.bf16.mxu0 %vm4276_vm4, %v5539_v60  ;;  %v837_v18 = vsub.f32 %v4268_v1, %v5522_v0  ;;  %vm4332_vm10 = vmpackc.low %vm5732_vm11, %vm5731_vm1  ;;  %v826_v56 = vand.u32 4294901760, %v825_v58  ;;  %v5534_v46 = vand.u32 4294901760, %v4308_v44  ;;  %v5530_v54 = vand.u32 4294901760, %v4324_v61 }
  0xcc   : > { %vm4346_vm5 = vmpackc.low %vm5739_vm2, %vm5737_vm6  ;;  %2906 = vmatprep.subr.bf16.mxu1 %v2905_v63  ;;  %v5529_v2 = vand.u32 4294901760, %v4338_v59  ;;  %v5531_v58 = vand.u32 4294901760, %v4352_v4  ;;  %v2909_v52 = vpack.c.bf16 %v856_v45, %v844_v16  ;;  %v4372_v63 = vsub.f32 %v5743_v20, %v5743_v20  ;;  %v5750_v16 = vld [vmem:[#allocation61_spill] sm:$0xff] }
  0xcd   : > { %v838_v0 = vand.u32 4294901760, %v837_v18  ;;  %v849_v19 = vsub.f32 %v4308_v44, %v5534_v46  ;;  %v861_v41 = vsub.f32 %v4324_v61, %v5530_v54  ;;  %vm5745_vm2 = vcmp.eq.s32.totalorder %v5736_v21, %v3851_v22  ;;  %v5751_v54 = vld [vmem:[#allocation28_spill] sm:$0xff] }
  0xce   : > { %v879_v45 = vsub.f32 %v4352_v4, %v5531_v58  ;;  %vm5746_vm1 = vcmp.eq.s32.totalorder %v5738_v49, %v3851_v22  ;;  %vm5752_vm6 = vcmp.eq.s32.totalorder %v5751_v54, %v3854_v23  ;;  %v5753_v58 = vld [vmem:[#allocation29_spill] sm:$0xff] }
  0xcf   : > { %v2907_v18 = vpack.c.bf16 %v838_v0, %v826_v56  ;;  %v867_v0 = vsub.f32 %v4338_v59, %v5529_v2  ;;  %vm4390_vm11 = vmpackc.low %vm5746_vm1, %vm5745_vm2  ;;  %v4396_v56 = vsub.f32 %v5749_v55, %v5749_v55  ;;  %v4400_v2 = vsub.f32 %v5750_v16, %v5750_v16 }
  0xd0   : > { %vm5754_vm3 = vcmp.eq.s32.totalorder %v5753_v58, %v3854_v23  ;;  %v850_v49 = vand.u32 4294901760, %v849_v19  ;;  %v862_v46 = vand.u32 4294901760, %v861_v41  ;;  %v5542_v55 = vand.u32 4294901760, %v4372_v63  ;;  %v5757_v19 = vld [vmem:[#allocation58_spill] sm:$0xff] }
  0xd1   : > { %2876 = vmatpush1.bf16.xpose.msk.msra.mxu0 %vm4332_vm10, %v5539_v60  ;;  %vm4408_vm0 = vmpackc.low %vm5754_vm3, %vm5752_vm6  ;;  %2908 = vmatpush1.bf16.xpose.msra.mxu1 %v2907_v18  ;;  %v868_v27 = vand.u32 4294901760, %v867_v0  ;;  %v880_v24 = vand.u32 4294901760, %v879_v45  ;;  %v4424_v41 = vsub.f32 %v5757_v19, %v5757_v19  ;;  %v5759_v45 = vld [vmem:[#allocation60_spill] sm:$0xff]  ;;  %v5760_v18 = vand.u32 4294901760, %v4396_v56 }
  0xd2   : > { %2878 = vmatprep.subr.msk.bf16.mxu0 %vm4346_vm5, %v5539_v60  ;;  %2910 = vmatprep.subr.bf16.mxu1 %v2909_v52  ;;  %v2911_v38 = vpack.c.bf16 %v862_v46, %v850_v49  ;;  %v873_v16 = vsub.f32 %v4372_v63, %v5542_v55  ;;  %v5758_v52 = vand.u32 4294901760, %v4376_v26  ;;  %v5761_v19 = vand.u32 4294901760, %v4400_v2 }
  0xd3   : > { %v2913_v62 = vpack.c.bf16 %v880_v24, %v868_v27  ;;  %v891_v35 = vsub.f32 %v4396_v56, %v5760_v18  ;;  %vm5762_vm3 = vcmp.eq.s32.totalorder %v5751_v54, %v3851_v22  ;;  %vm5763_vm2 = vcmp.eq.s32.totalorder %v5753_v58, %v3851_v22 }
  0xd4   : > { %v885_v0 = vsub.f32 %v4376_v26, %v5758_v52  ;;  %v903_v46 = vsub.f32 %v4400_v2, %v5761_v19  ;;  %vm4448_vm1 = vmpackc.low %vm5763_vm2, %vm5762_vm3  ;;  %v874_v24 = vand.u32 4294901760, %v873_v16  ;;  %v5766_v52 = vmov 1.0|1.0  }
  0xd5   : > { %v5547_v18 = vand.u32 4294901760, %v4424_v41  ;;  %v892_v54 = vand.u32 4294901760, %v891_v35  ;;  %v617_v35 = vld [vmem:[#allocation3] sm:$0x1]  ;;  %vm1531_vm6 = vcmask 0   ;;  %vm5777_vm2 = vcmp.eq.s32.totalorder %v5776_v11, %v3854_v23 }
  0xd6   : > { %v886_v27 = vand.u32 4294901760, %v885_v0  ;;  %v904_v19 = vand.u32 4294901760, %v903_v46 }
  0xd7   : > { %v897_v58 = vsub.f32 %v4424_v41, %v5547_v18 }
  0xd8   : > { %v2915_v55 = vpack.c.bf16 %v886_v27, %v874_v24  ;;  %v2917_v16 = vpack.c.bf16 %v904_v19, %v892_v54  ;;  %v5768_v24 = vld [vmem:[#allocation65_spill] sm:$0xff] }
  0xd9   : > { %2880 = vmatpush1.bf16.xpose.msk.msra.mxu0 %vm4390_vm11, %v5539_v60  ;;  %2912 = vmatpush1.bf16.xpose.msra.mxu1 %v2911_v38  ;;  %v898_v0 = vand.u32 4294901760, %v897_v58  ;;  %v4469_v27 = vsub.f32 %v5768_v24, %v5768_v24 }
  0xda   : > { %2882 = vmatprep.subr.msk.bf16.mxu0 %vm4408_vm0, %v5539_v60  ;;  %v4434_v60 = vsub.f32 %v5759_v45, %v5759_v45  ;;  %2914 = vmatprep.subr.bf16.mxu1 %v2913_v62  ;;  %v5767_v62 = vld [vmem:[#allocation63_spill] sm:$0xff] }
  0xdb   : > { %v4465_v46 = vsub.f32 %v5767_v62, %v5767_v62  ;;  %v5552_v58 = vand.u32 4294901760, %v4469_v27 }
  0xdc   : > { %v5546_v45 = vand.u32 4294901760, %v4434_v60 }
  0xdd   : > { %v5550_v19 = vand.u32 4294901760, %v4465_v46  ;;  %v927_v24 = vsub.f32 %v4469_v27, %v5552_v58  ;;  %v5773_v58 = vld [vmem:[#allocation69_spill] sm:$0xff] }
  0xde   : > { %v909_v38 = vsub.f32 %v4434_v60, %v5546_v45  ;;  %v4501_v30 = vsub.f32 %v5773_v58, %v5773_v58 }
  0xdf   : > { %v915_v62 = vsub.f32 %v4465_v46, %v5550_v19  ;;  %v928_v18 = vand.u32 4294901760, %v927_v24  ;;  %v5772_v19 = vld [vmem:[#allocation67_spill] sm:$0xff] }
  0xe0   : > { %v910_v33 = vand.u32 4294901760, %v909_v38  ;;  %v4497_v32 = vsub.f32 %v5772_v19, %v5772_v19  ;;  %v5781_v19 = vld [vmem:[#allocation68_spill] sm:$0xff] }
  0xe1   : > { %2884 = vmatpush1.bf16.xpose.msk.msra.mxu0 %vm4448_vm1, %v5766_v52  ;;  %2916 = vmatpush1.bf16.xpose.msra.mxu1 %v2915_v55  ;;  %v5769_v55 = vld [vmem:[#allocation62_spill] sm:$0xff] }
  0xe2   : > { %2918 = vmatprep.subr.bf16.mxu1 %v2917_v16  ;;  %v2919_v36 = vpack.c.bf16 %v910_v33, %v898_v0  ;;  %v4473_v54 = vsub.f32 %v5769_v55, %v5769_v55  ;;  %v5770_v33 = vld [vmem:[#allocation64_spill] sm:$0xff]  ;;  %v5572_v58 = vand.u32 4294901760, %v4497_v32 }
  0xe4   : > { %v5554_v38 = vand.u32 4294901760, %v4473_v54 }
  0xe9   : > { %2920 = vmatpush1.bf16.xpose.msra.mxu1 %v2919_v36  ;;  %v4477_v36 = vsub.f32 %v5770_v33, %v5770_v33 }
  0xeb   : > { %5771 = vst [vmem:[#allocation72_spill] sm:$0xff] %v4477_v36  ;;  %v5560_v16 = vand.u32 4294901760, %v4477_v36 }
  0xed   : > { %v933_v55 = vsub.f32 %v4477_v36, %v5560_v16 }
  0xef   : > { %v934_v31 = vand.u32 4294901760, %v933_v55  ;;  %v5570_v55 = vand.u32 4294901760, %v4501_v30 }
 0x151   : > { %v620_v34 = vpop.xlane.xlu0 %619 }
 0x152   : > { %3259 = vpush %v620_v34 }
 0x183   : > { %s3260_s26 = spop %3259 }
 0x184   : > { %v622_v45 = vstv %s3260_s26 }
 0x185   : > { %v623_v34 = vmax.f32 %v617_v35, %v622_v45  ;;  %v921_v45 = vsub.f32 %v4473_v54, %v5554_v38  ;;  %v5774_v38 = vld [vmem:[#allocation30_spill] sm:$0xff] }
 0x186   : > { %vm5775_vm3 = vcmp.eq.s32.totalorder %v5774_v38, %v3854_v23 }
 0x187   : > { %v624_v0 = vsub.f32 %v617_v35, %v623_v34  ;;  %1532 = vst.msk [vmem:[#allocation3] sm:$0x1] %vm1531_vm6, %v623_v34  ;;  %629 = vperm.xlu0 %3361, %v623_v34   ;;  %v916_v35 = vand.u32 4294901760, %v915_v62  ;;  %v922_v34 = vand.u32 4294901760, %v921_v45  ;;  %vm4509_vm6 = vmpackc.low %vm5777_vm2, %vm5775_vm3  ;;  %v4519_v45 = vsub.f32 %v5781_v19, %v5781_v19 }
 0x188   : > { %2886 = vmatprep.subr.msk.bf16.mxu0 %vm4509_vm6, %v5766_v52  ;;  %vm5783_vm3 = vcmp.eq.s32.totalorder %v5774_v38, %v3851_v22  ;;  %vm5784_vm2 = vcmp.eq.s32.totalorder %v5776_v11, %v3851_v22  ;;  %v5788_v38 = vld [vmem:[#allocation35_spill] sm:$0xff]  ;;  %v5789_v11 = vmov 0 }
 0x189   : > { %v625_v33 = vmul.f32 1.442695, %v624_v0  ;;  %v2921_v29 = vpack.c.bf16 %v928_v18, %v916_v35  ;;  %v5778_v0 = vmov 0  ;;  %v2923_v62 = vpack.c.bf16 %v934_v31, %v922_v34  ;;  %v5780_v18 = vld [vmem:[#allocation66_spill] sm:$0xff]  ;;  %5782 = vst [vmem:[#allocation73_spill] sm:$0xff] %v4519_v45  ;;  %vm4530_vm14 = vmpackc.low %vm5784_vm2, %vm5783_vm3 }
 0x18a   : > { %v5779_v0 = vsel %vm4509_vm6, 4294967295, %v5778_v0  ;;  %v4515_v24 = vsub.f32 %v5780_v18, %v5780_v18  ;;  %v5785_v31 = vmov 0  ;;  %2888 = vmatpush1.bf16.xpose.msk.msra.mxu0 %vm4530_vm14, %v5766_v52  ;;  %vm4545_vm6 = vmpackc.low %vm5569_vm15, %vm5573_vm13  ;;  %v5580_v35 = vand.u32 4294901760, %v4519_v45 }
 0x18b   : > { %3375 = vpow2.f32 %v625_v33  ;;  %2922 = vmatprep.subr.bf16.mxu1 %v2921_v29  ;;  %v5786_v31 = vsel %vm4530_vm14, 4294967295, %v5785_v31  ;;  %v5787_v29 = vld [vmem:[#allocation34_spill] sm:$0xff]  ;;  %v5790_v11 = vsel %vm4545_vm6, 4294967295, %v5789_v11  ;;  %2890 = vmatprep.subr.msk.bf16.mxu0 %vm4545_vm6, %v5766_v52  ;;  %v939_v34 = vsub.f32 %v4497_v32, %v5572_v58 }
 0x18c   : > { %2924 = vmatpush1.bf16.xpose.msra.mxu1 %v2923_v62  ;;  %v5571_v33 = vand.u32 4294901760, %v4515_v24  ;;  %v951_v62 = vsub.f32 %v4501_v30, %v5570_v55  ;;  %v957_v19 = vsub.f32 %v4519_v45, %v5580_v35  ;;  %vm5791_vm3 = vcmp.eq.s32.totalorder %v5787_v29, %v3851_v22  ;;  %v5807_v35 = vld [vmem:[#allocation25_spill] sm:$0xff] }
 0x18d   : > { %v940_v16 = vand.u32 4294901760, %v939_v34  ;;  %vm5792_vm2 = vcmp.eq.s32.totalorder %v5788_v38, %v3851_v22  ;;  %v5793_v55 = vmov 0 }
 0x18e   : > { %v945_v18 = vsub.f32 %v4515_v24, %v5571_v33  ;;  %v952_v10 = vand.u32 4294901760, %v951_v62  ;;  %v958_v5 = vand.u32 4294901760, %v957_v19  ;;  %vm4572_vm15 = vmpackc.low %vm5792_vm2, %vm5791_vm3  ;;  %v5806_v19 = vld [vmem:[#allocation18_spill] sm:$0xff] }
 0x18f   : > { %v5794_v55 = vsel %vm4572_vm15, 4294967295, %v5793_v55 }
 0x190   : > { %v946_v9 = vand.u32 4294901760, %v945_v18  ;;  %v2925_v36 = vpack.c.bf16 %v952_v10, %v940_v16  ;;  %v5795_v10 = vld [vmem:[#allocation36_spill] sm:$0xff]  ;;  %v5797_v16 = vld [vmem:[#allocation37_spill] sm:$0xff] }
 0x191   : > { %vm5796_vm13 = vcmp.eq.s32.totalorder %v5795_v10, %v3854_v23  ;;  %vm5798_vm6 = vcmp.eq.s32.totalorder %v5797_v16, %v3854_v23  ;;  %vm5801_vm3 = vcmp.eq.s32.totalorder %v5795_v10, %v3851_v22  ;;  %vm5802_vm2 = vcmp.eq.s32.totalorder %v5797_v16, %v3851_v22 }
 0x192   : > { %v2927_v33 = vpack.c.bf16 %v958_v5, %v946_v9  ;;  %2926 = vmatprep.subr.bf16.mxu1 %v2925_v36  ;;  %2892 = vmatpush1.bf16.xpose.msk.msra.mxu0 %vm4572_vm15, %v5766_v52  ;;  %vm4585_vm14 = vmpackc.low %vm5798_vm6, %vm5796_vm13  ;;  %v2929_v9 = vpack.c.bf16 %v4147_v15, %v4143_v6  ;;  %v642_v10 = vsub.f32 1.0, %v5806_v19  ;;  %v2939_v19 = vpack.c.bf16 %v4268_v1, %v4264_v57 }
 0x193   : > { %2894 = vmatprep.subr.msk.bf16.mxu0 %vm4585_vm14, %v5766_v52  ;;  %vm4601_vm15 = vmpackc.low %vm5802_vm2, %vm5801_vm3  ;;  %vm5808_vm13 = vnez %v5779_v0  ;;  %vm5809_vm6 = vnez %v5786_v31  ;;  %vm5810_vm3 = vnez %v5790_v11  ;;  %vm5811_vm2 = vnez %v5794_v55 }
 0x194   : > { %2928 = vmatpush1.bf16.xpose.msra.mxu1 %v2927_v33  ;;  %v651_v22 = vrot.slane %v642_v10, %v5807_v35  ;;  %v5846_v55 = vand.u32 4294901760, %v4515_v24 }
 0x195   : > { %v3376_v58 = vpop.eup %3375  ;;  %2962 = vmatprep.subr.msk.bf16.mxu1 %vm4163_vm8, %v5766_v52 }
 0x196   : > { %1521 = vperm.xlu1 %3362, %v3376_v58   ;;  %v5805_v58 = vld [vmem:[#allocation24_spill] sm:$0xff] }
 0x197   : > { %v647_v16 = vrot.slane %v642_v10, %v5805_v58  ;;  %v2941_v10 = vpack.c.bf16 %v4288_v48, %v4284_v17 }
 0x19a   : > { %2896 = vmatpush1.bf16.xpose.msk.msra.mxu0 %vm4601_vm15, %v5766_v52 }
 0x19b   : > { %2930 = vmatprep.subr.bf16.mxu0 %v2929_v9 }
 0x206   : > { %v630_v36 = vpop.permute.xlu0 %629 }
 0x207   : > { %v635_v38 = vrot.slane %v630_v36, %v5805_v58 }
 0x209   : > { %v636_v33 = vsub.f32 %v4128_v12, %v635_v38  ;;  %v637_v34 = vsub.f32 %v4133_v53, %v635_v38 }
 0x20b   : > { %v638_v62 = vmul.f32 1.442695, %v636_v33  ;;  %v640_v18 = vmul.f32 1.442695, %v637_v34  ;;  %v2933_v34 = vpack.c.bf16 %v4173_v50, %v4169_v7 }
 0x20d   : > { %3377 = vpow2.f32 %v638_v62  ;;  %v2935_v62 = vpack.c.bf16 %v4214_v47, %v4187_v14 }
 0x20e   : > { %3379 = vpow2.f32 %v640_v18  ;;  %v2937_v18 = vpack.c.bf16 %v4250_v39, %v4246_v13  ;;  %v5829_v39 = vand.u32 4294901760, %v4288_v48  ;;  %v5833_v48 = vand.u32 4294901760, %v4352_v4 }
 0x217   : > { %v3378_v23 = vpop.eup %3377 }
 0x218   : > { %v3380_v15 = vpop.eup %3379  ;;  %v654_v9 = vmul.f32 %v3378_v23, %v647_v16  ;;  %v2943_v16 = vpack.c.bf16 %v4324_v61, %v4308_v44 }
 0x219   : > { %v655_v6 = vmul.f32 %v3380_v15, %v651_v22 }
 0x21a   : > { %v4616_v45 = vand.u32 4294901760, %v654_v9 }
 0x21b   : > { %v4618_v36 = vand.u32 4294901760, %v655_v6 }
 0x21c   : > { %v4621_v12 = vsub.f32 %v654_v9, %v4616_v45  ;;  %v2945_v9 = vpack.c.bf16 %v4352_v4, %v4338_v59  ;;  %v5837_v4 = vand.u32 4294901760, %v4400_v2 }
 0x21d   : > { %993 = vmatprep.mubr.f32.mxu1 %v4618_v36  ;;  %v753_v53 = vsub.f32 %v655_v6, %v4618_v36  ;;  %v2931_v6 = vpack.c.bf16 %v4155_v3, %v4151_v51  ;;  %v5822_v51 = vand.u32 4294901760, %v4187_v14  ;;  %v5826_v14 = vand.u32 4294901760, %v4264_v57 }
 0x21e   : > { %995 = vmatmul.mubr.f32.vlgmr.msra.gmra.mrb[0].mxu1 %v4616_v45  ;;  %v760_v38 = vand.u32 4294901760, %v4621_v12  ;;  %v5830_v57 = vand.u32 4294901760, %v4308_v44  ;;  %v5834_v44 = vand.u32 4294901760, %v4372_v63 }
 0x21f   : > { %2964 = vmatpush1.bf16.xpose.msk.msra.mxu1 %vm4181_vm9, %v5766_v52  ;;  %v754_v22 = vand.u32 4294901760, %v753_v53 }
 0x220   : > { %2966 = vmatprep.subr.msk.bf16.mxu1 %vm4202_vm7, %v5766_v52  ;;  %v761_v23 = vsub.f32 %v4621_v12, %v760_v38 }
 0x221   : > { %1237 = vmatprep.mubr.f32.mxu1 %v754_v22  ;;  %v755_v15 = vsub.f32 %v753_v53, %v754_v22  ;;  %v2949_v22 = vpack.c.bf16 %v4400_v2, %v4396_v56  ;;  %v5841_v2 = vand.u32 4294901760, %v4469_v27 }
 0x222   : > { %v762_v35 = vand.u32 4294901760, %v761_v23  ;;  %v2951_v23 = vpack.c.bf16 %v4434_v60, %v4424_v41 }
 0x223   : > { %v756_v33 = vand.u32 4294901760, %v755_v15  ;;  %v2953_v15 = vpack.c.bf16 %v4469_v27, %v4465_v46  ;;  %v5845_v27 = vand.u32 4294901760, %v4501_v30 }
 0x225   : > { %757 = vmatprep.mubr.f32.mxu0 %v756_v33 }
 0x226   : > { %763 = vmatmul.mubr.f32.vlgmr.msra.gmra.mrb[0].mxu0 %v762_v35  ;;  %v5812_v35 = vld [vmem:[#allocation72_spill] sm:$0xff] }
 0x227   : > { %2932 = vmatpush1.bf16.xpose.msra.mxu0 %v2931_v6  ;;  %2968 = vmatpush1.bf16.xpose.msk.msra.mxu1 %vm4258_vm12, %v5766_v52  ;;  %v2955_v33 = vpack.c.bf16 %v5812_v35, %v4473_v54  ;;  %v2957_v6 = vpack.c.bf16 %v4501_v30, %v4497_v32 }
 0x228   : > { %1130 = vmatprep.mubr.f32.mxu0 %v753_v53  ;;  %2934 = vmatprep.subr.bf16.mxu0 %v2933_v34  ;;  %v2947_v53 = vpack.c.bf16 %v4376_v26, %v4372_v63  ;;  %v5813_v34 = vld [vmem:[#allocation73_spill] sm:$0xff]  ;;  %v5838_v63 = vand.u32 4294901760, %v4424_v41  ;;  %v5842_v41 = vand.u32 4294901760, %v4473_v54 }
 0x229   : > { %2970 = vmatprep.subr.msk.bf16.mxu1 %vm4276_vm4, %v5766_v52  ;;  %v5847_v29 = vand.u32 4294901760, %v5813_v34 }
 0x22f   : > { %2936 = vmatpush1.bf16.xpose.msra.mxu0 %v2935_v62  ;;  %2972 = vmatpush1.bf16.xpose.msk.msra.mxu1 %vm4332_vm10, %v5766_v52  ;;  %v2959_v62 = vpack.c.bf16 %v5813_v34, %v4515_v24  ;;  %v1522_v34 = vpop.permute.xlu1 %1521 }
 0x230   : > { %2938 = vmatprep.subr.bf16.mxu0 %v2937_v18  ;;  %2974 = vmatprep.subr.msk.bf16.mxu1 %vm4346_vm5, %v5766_v52  ;;  %v5814_v18 = vld [vmem:[#allocation70_spill] sm:$0xff] }
 0x237   : > { %2940 = vmatpush1.bf16.xpose.msra.mxu0 %v2939_v19  ;;  %2976 = vmatpush1.bf16.xpose.msk.msra.mxu1 %vm4390_vm11, %v5766_v52  ;;  %v5815_v19 = vand.u32 4294901760, %v5814_v18 }
 0x238   : > { %2942 = vmatprep.subr.bf16.mxu0 %v2941_v10  ;;  %2978 = vmatprep.subr.msk.bf16.mxu1 %vm4408_vm0, %v5766_v52  ;;  %v5816_v10 = vld [vmem:[#allocation71_spill] sm:$0xff] }
 0x23f   : > { %2944 = vmatpush1.bf16.xpose.msra.mxu0 %v2943_v16  ;;  %2980 = vmatpush1.bf16.xpose.msk.msra.mxu1 %vm4448_vm1, %v5766_v52  ;;  %v5817_v16 = vand.u32 4294901760, %v5816_v10  ;;  %v1527_v10 = vrot.slane %v1522_v34, %v5805_v58 }
 0x240   : > { %2946 = vmatprep.subr.bf16.mxu0 %v2945_v9  ;;  %2982 = vmatprep.subr.msk.bf16.mxu1 %vm5808_vm13, %v5766_v52 }
 0x241   : > { %v2993_v9 = vpack.c.bf16 %v5817_v16, %v5815_v19  ;;  %v1518_v16 = vld [vmem:[#allocation4] sm:$0x1] }
 0x247   : > { %2948 = vmatpush1.bf16.xpose.msra.mxu0 %v2947_v53  ;;  %2984 = vmatpush1.bf16.xpose.msk.msra.mxu1 %vm5809_vm6, %v5766_v52  ;;  %v5819_v53 = vand.u32 4294901760, %v4155_v3  ;;  %v5823_v3 = vand.u32 4294901760, %v4214_v47  ;;  %v5827_v47 = vand.u32 4294901760, %v4268_v1  ;;  %v5831_v1 = vand.u32 4294901760, %v4324_v61 }
 0x248   : > { %2950 = vmatprep.subr.bf16.mxu0 %v2949_v22  ;;  %2986 = vmatprep.subr.msk.bf16.mxu1 %vm5810_vm3, %v5766_v52  ;;  %v5835_v61 = vand.u32 4294901760, %v4376_v26  ;;  %v5839_v26 = vand.u32 4294901760, %v4434_v60  ;;  %v5843_v60 = vand.u32 4294901760, %v5812_v35 }
 0x249   : > { %v2995_v22 = vpack.c.bf16 %v5819_v53, %v5818_v8  ;;  %v3003_v42 = vpack.c.bf16 %v5827_v47, %v5826_v14  ;;  %v3007_v43 = vpack.c.bf16 %v5831_v1, %v5830_v57  ;;  %v1528_v53 = vmul.f32 %v1527_v10, %v1518_v16 }
 0x24a   : > { %v3011_v20 = vpack.c.bf16 %v5835_v61, %v5834_v44  ;;  %v3015_v49 = vpack.c.bf16 %v5839_v26, %v5838_v63  ;;  %v3019_v31 = vpack.c.bf16 %v5843_v60, %v5842_v41 }
 0x24f   : > { %2952 = vmatpush1.bf16.xpose.msra.mxu0 %v2951_v23  ;;  %2988 = vmatpush1.bf16.xpose.msk.msra.mxu1 %vm5811_vm2, %v5766_v52  ;;  %v5820_v23 = vand.u32 4294901760, %v4169_v7  ;;  %v2999_v7 = vpack.c.bf16 %v5823_v3, %v5822_v51 }
 0x250   : > { %2954 = vmatprep.subr.bf16.mxu0 %v2953_v15  ;;  %2990 = vmatprep.subr.msk.bf16.mxu1 %vm4585_vm14, %v5766_v52 }
 0x257   : > { %2956 = vmatpush1.bf16.xpose.msra.mxu0 %v2955_v33  ;;  %2992 = vmatpush1.bf16.xpose.msk.msra.mxu1 %vm4601_vm15, %v5766_v52 }
 0x258   : > { %2958 = vmatprep.subr.bf16.mxu0 %v2957_v6  ;;  %3026 = vmatprep.subr.msk.bf16.mxu1 %vm4163_vm8, %v5766_v52 }
 0x25e   : > { %1241 = vmatmul.mubr.f32.vlgmr.msra.gmra.mrb[2].mxu1 %v760_v38  ;;  %v5821_v38 = vand.u32 4294901760, %v4173_v50  ;;  %v5824_v50 = vand.u32 4294901760, %v4246_v13  ;;  %v5828_v13 = vand.u32 4294901760, %v4284_v17  ;;  %v5832_v17 = vand.u32 4294901760, %v4338_v59 }
 0x25f   : > { %2960 = vmatpush1.bf16.xpose.msra.mxu0 %v2959_v62  ;;  %3028 = vmatpush1.bf16.xpose.msk.msra.mxu1 %vm4181_vm9, %v5766_v52  ;;  %v5836_v59 = vand.u32 4294901760, %v4396_v56  ;;  %v5840_v56 = vand.u32 4294901760, %v4465_v46  ;;  %v5844_v46 = vand.u32 4294901760, %v4497_v32 }
 0x260   : > { %1511 = vmatprep.mubr.f32.mxu1 %v4618_v36  ;;  %2994 = vmatprep.subr.bf16.mxu0 %v2993_v9  ;;  %v2997_v15 = vpack.c.bf16 %v5821_v38, %v5820_v23  ;;  %v3001_v25 = vpack.c.bf16 %v5825_v28, %v5824_v50  ;;  %v3005_v40 = vpack.c.bf16 %v5829_v39, %v5828_v13 }
 0x261   : > { %3030 = vmatprep.subr.msk.bf16.mxu1 %vm4202_vm7, %v5766_v52  ;;  %v3009_v37 = vpack.c.bf16 %v5833_v48, %v5832_v17  ;;  %v3013_v21 = vpack.c.bf16 %v5837_v4, %v5836_v59  ;;  %v3017_v0 = vpack.c.bf16 %v5841_v2, %v5840_v56  ;;  %v3021_v11 = vpack.c.bf16 %v5845_v27, %v5844_v46 }
 0x266   : > { %1133 = vmatmul.mubr.f32.vlgmr.msra.gmra.mrb[2].mxu0 %v4621_v12 }
 0x267   : > { %2996 = vmatpush1.bf16.xpose.msra.mxu0 %v2995_v22  ;;  %1407 = vmatprep.mubr.f32.mxu0 %v4618_v36  ;;  %v3023_v36 = vpack.c.bf16 %v5847_v29, %v5846_v55 }
 0x268   : > { %3032 = vmatpush1.bf16.xpose.msk.msra.mxu1 %vm4258_vm12, %v5766_v52  ;;  %2998 = vmatprep.subr.bf16.mxu0 %v2997_v15 }
 0x269   : > { %3034 = vmatprep.subr.msk.bf16.mxu1 %vm4276_vm4, %v5766_v52 }
 0x26f   : > { %3000 = vmatpush1.bf16.xpose.msra.mxu0 %v2999_v7 }
 0x270   : > { %3036 = vmatpush1.bf16.xpose.msk.msra.mxu1 %vm4332_vm10, %v5766_v52  ;;  %3002 = vmatprep.subr.bf16.mxu0 %v3001_v25 }
 0x271   : > { %3038 = vmatprep.subr.msk.bf16.mxu1 %vm4346_vm5, %v5766_v52 }
 0x277   : > { %3004 = vmatpush1.bf16.xpose.msra.mxu0 %v3003_v42 }
 0x278   : > { %3040 = vmatpush1.bf16.xpose.msk.msra.mxu1 %vm4390_vm11, %v5766_v52  ;;  %3006 = vmatprep.subr.bf16.mxu0 %v3005_v40 }
 0x279   : > { %3042 = vmatprep.subr.msk.bf16.mxu1 %vm4408_vm0, %v5766_v52 }
 0x27f   : > { %3008 = vmatpush1.bf16.xpose.msra.mxu0 %v3007_v43 }
 0x280   : > { %3044 = vmatpush1.bf16.xpose.msk.msra.mxu1 %vm4448_vm1, %v5766_v52  ;;  %3010 = vmatprep.subr.bf16.mxu0 %v3009_v37 }
 0x281   : > { %3046 = vmatprep.subr.msk.bf16.mxu1 %vm5808_vm13, %v5766_v52 }
 0x287   : > { %3012 = vmatpush1.bf16.xpose.msra.mxu0 %v3011_v20 }
 0x288   : > { %3048 = vmatpush1.bf16.xpose.msk.msra.mxu1 %vm5809_vm6, %v5766_v52  ;;  %3014 = vmatprep.subr.bf16.mxu0 %v3013_v21 }
 0x289   : > { %3050 = vmatprep.subr.msk.bf16.mxu1 %vm5810_vm3, %v5766_v52 }
 0x28f   : > { %3016 = vmatpush1.bf16.xpose.msra.mxu0 %v3015_v49 }
 0x290   : > { %3052 = vmatpush1.bf16.xpose.msk.msra.mxu1 %vm5811_vm2, %v5766_v52  ;;  %3018 = vmatprep.subr.bf16.mxu0 %v3017_v0 }
 0x291   : > { %3054 = vmatprep.subr.msk.bf16.mxu1 %vm4585_vm14, %v5766_v52 }
 0x297   : > { %3020 = vmatpush1.bf16.xpose.msra.mxu0 %v3019_v31 }
 0x298   : > { %3056 = vmatpush1.bf16.xpose.msk.msra.mxu1 %vm4601_vm15, %v5766_v52  ;;  %3022 = vmatprep.subr.bf16.mxu0 %v3021_v11 }
 0x29f   : > { %1513 = vmatmul.mubr.f32.vlgmr.msra.gmra.mrb[4].mxu1 %v4616_v45  ;;  %3024 = vmatpush1.bf16.xpose.msra.mxu0 %v3023_v36 }
 0x2a6   : > { %1409 = vmatmul.mubr.f32.vlgmr.msra.gmra.mrb[4].mxu0 %v4616_v45 }
 0x2f1   : > { %v996_v32 = vpop.f32.mrb[0].mxu1 }
 0x2f2   : > { %v998_v54 = vpop.f32.mrb[1].mxu1 }
 0x2f9   : > { %v764_v30 = vpop.f32.mrb[0].mxu0 }
 0x2fa   : > { %v997_v12 = vadd.f32 %v996_v32, %v764_v30  ;;  %v766_v35 = vpop.f32.mrb[1].mxu0 }
 0x331   : > { %v1242_v33 = vpop.f32.mrb[2].mxu1 }
 0x332   : > { %v1244_v6 = vpop.f32.mrb[3].mxu1 }
 0x339   : > { %v1134_v5 = vpop.f32.mrb[2].mxu0 }
 0x33a   : > { %v1135_v52 = vadd.f32 %v1134_v5, %v997_v12  ;;  %v1136_v62 = vpop.f32.mrb[3].mxu0 }
 0x33c   : > { %v1243_v18 = vadd.f32 %v1242_v33, %v1135_v52 }
 0x372   : > { %v1514_v24 = vpop.f32.mrb[4].mxu1 }
 0x373   : > { %v1516_v19 = vpop.f32.mrb[5].mxu1 }
 0x379   : > { %v1410_v9 = vpop.f32.mrb[4].mxu0 }
 0x37a   : > { %v1411_v8 = vadd.f32 %v1410_v9, %v1243_v18  ;;  %v1412_v45 = vpop.f32.mrb[5].mxu0 }
 0x37c   : > { %v1515_v22 = vadd.f32 %v1514_v24, %v1411_v8 }
 0x37e   : > { %v1529_v23 = vadd.f32 %v1528_v53, %v1515_v22 }
 0x380   : > { %1530 = vst [vmem:[#allocation4] sm:$0x1] %v1529_v23 }
 0x381 PF: > { %p2760_p4 = scmp.ne.s32.totalorder %s3538_s19, 1 }
 0x383   : > { %1536 = sbr.rel (%p2760_p4) target bundleno = 1497 (0x5d9), region = 56 }
 0x38a   : > { %v5848_v38 = vld [vmem:[#allocation17_spill] sm:$0xff]  ;;  %v5851_v51 = vld [vmem:[#allocation19_spill] sm:$0xff]  ;;  %v5595_v3 = vmov 1.0|1.0   ;;  %v5855_v7 = vld [vmem:[#allocation32_spill] sm:$0xff]  ;;  %v5592_v43 = vmov 0.0  }
 0x38b   : > { %v5849_v15 = vld [vmem:[#allocation33_spill] sm:$0xff]  ;;  %vm5856_vm14 = vcmp.eq.s32.totalorder %v5848_v38, %v5855_v7  ;;  %vm5857_vm15 = vcmp.eq.s32.totalorder %v5851_v51, %v5855_v7  ;;  %v1553_v28 = vld [vmem:[#allocation4] sm:$0x1]  ;;  %v5870_v13 = vld [vmem:[#allocation39_spill] sm:$0xff]  ;;  %1651 = vmatprep.mubr.f32.mxu1 %v5592_v43  ;;  %2128 = vmatprep.mubr.f32.mxu0 %v5592_v43  ;;  %v5882_v4 = vmov 0  ;;  %v5891_v41 = vmov 0 }
 0x38c   : > { %vm5850_vm0 = vcmp.eq.s32.totalorder %v5848_v38, %v5849_v15  ;;  %vm5852_vm4 = vcmp.eq.s32.totalorder %v5851_v51, %v5849_v15  ;;  %vm4844_vm8 = vmpackc.low %vm5857_vm15, %vm5856_vm14  ;;  %v5860_v25 = vld [vmem:[#allocation20_spill] sm:$0xff]  ;;  %v5862_v14 = vld [vmem:[#allocation21_spill] sm:$0xff]  ;;  %v4882_v39 = vsub.f32 %v5870_v13, %v5870_v13  ;;  %v1554_v37 = vmax.f32 %v1553_v28, 0.0  ;;  %s1538_s19 = scalar_lea.vmem [#allocation2], %s3782_s25  ;;  %p2858_p11 = scmp.ne.s32.totalorder %s3534_s18, 1 }
 0x38d   : > { %vm4828_vm5 = vmpackc.low %vm5852_vm4, %vm5850_vm0  ;;  %vm5861_vm9 = vcmp.eq.s32.totalorder %v5860_v25, %v5849_v15  ;;  %vm5863_vm7 = vcmp.eq.s32.totalorder %v5862_v14, %v5849_v15  ;;  %vm5866_vm10 = vcmp.eq.s32.totalorder %v5860_v25, %v5855_v7  ;;  %vm5867_vm11 = vcmp.eq.s32.totalorder %v5862_v14, %v5855_v7  ;;  %v5871_v40 = vld [vmem:[#allocation22_spill] sm:$0xff]  ;;  %v5873_v57 = vld [vmem:[#allocation23_spill] sm:$0xff] }
 0x38e   : > { %3058 = vmatprep.subr.msk.bf16.mxu1 %vm4828_vm5, %v5595_v3  ;;  %3154 = vmatprep.subr.msk.bf16.mxu0 %vm4828_vm5, %v5595_v3  ;;  %vm4860_vm12 = vmpackc.low %vm5863_vm7, %vm5861_vm9  ;;  %vm5872_vm13 = vcmp.eq.s32.totalorder %v5871_v40, %v5849_v15  ;;  %vm5874_vm6 = vcmp.eq.s32.totalorder %v5873_v57, %v5849_v15  ;;  %v5877_v17 = vld [vmem:[#allocation41_spill] sm:$0xff]  ;;  %v5878_v44 = vld [vmem:[#allocation38_spill] sm:$0xff]  ;;  %vm5880_vm2 = vcmp.eq.s32.totalorder %v5871_v40, %v5855_v7  ;;  %v1665_v21 = vand.u32 4294901760, %v4882_v39 }
 0x38f   : > { %3060 = vmatpush1.bf16.msk.msra.mxu1 %vm4844_vm8, %v5595_v3  ;;  %3156 = vmatpush1.bf16.msk.msra.mxu0 %vm4844_vm8, %v5595_v3  ;;  %vm4876_vm1 = vmpackc.low %vm5867_vm11, %vm5866_vm10  ;;  %v4897_v48 = vsub.f32 %v5877_v17, %v5877_v17  ;;  %v4902_v61 = vsub.f32 %v5878_v44, %v5878_v44  ;;  %v5879_v20 = vld [vmem:[#allocation40_spill] sm:$0xff]  ;;  %vm5881_vm0 = vcmp.eq.s32.totalorder %v5873_v57, %v5855_v7  ;;  %v5885_v63 = vld [vmem:[#allocation43_spill] sm:$0xff]  ;;  %v4950_v31 = vand.u32 4294901760, %v1554_v37 }
 0x390   : > { %3062 = vmatprep.subr.msk.bf16.mxu1 %vm4860_vm12, %v5595_v3  ;;  %3158 = vmatprep.subr.msk.bf16.mxu0 %vm4860_vm12, %v5595_v3  ;;  %vm4890_vm3 = vmpackc.low %vm5874_vm6, %vm5872_vm13  ;;  %v4906_v59 = vsub.f32 %v5879_v20, %v5879_v20  ;;  %v4933_v26 = vsub.f32 %v5885_v63, %v5885_v63  ;;  %v5886_v49 = vld [vmem:[#allocation45_spill] sm:$0xff]  ;;  %v5887_v2 = vld [vmem:[#allocation26_spill] sm:$0xff]  ;;  %v5896_v55 = vmov 0  ;;  %v1666_v29 = vsub.f32 %v4882_v39, %v1665_v21 }
 0x391   : > { %vm4926_vm4 = vmpackc.low %vm5881_vm0, %vm5880_vm2  ;;  %v4937_v56 = vsub.f32 %v5886_v49, %v5886_v49  ;;  %vm5888_vm14 = vcmp.eq.s32.totalorder %v5887_v2, %v5849_v15  ;;  %v5889_v0 = vld [vmem:[#allocation27_spill] sm:$0xff]  ;;  %v1677_v60 = vand.u32 4294901760, %v4897_v48  ;;  %v1671_v46 = vand.u32 4294901760, %v4902_v61  ;;  %v1540_v11 = vld [vmem:[#allocation3] sm:$0x1] }
 0x392   : > { %v5883_v4 = vsel %vm4926_vm4, 4294967295, %v5882_v4  ;;  %vm5890_vm15 = vcmp.eq.s32.totalorder %v5889_v0, %v5849_v15  ;;  %v1683_v27 = vand.u32 4294901760, %v4906_v59  ;;  %vm5894_vm7 = vcmp.eq.s32.totalorder %v5887_v2, %v5855_v7  ;;  %v5899_v54 = vld [vmem:[#allocation28_spill] sm:$0xff]  ;;  %v5901_v30 = vld [vmem:[#allocation29_spill] sm:$0xff]  ;;  %v5907_v5 = vld [vmem:[#allocation42_spill] sm:$0xff] }
 0x393   : > { %3064 = vmatpush1.bf16.msk.msra.mxu1 %vm4876_vm1, %v5595_v3  ;;  %3160 = vmatpush1.bf16.msk.msra.mxu0 %vm4876_vm1, %v5595_v3  ;;  %5884 = vst [vmem:[#allocation74_spill] sm:$0xff] %v5883_v4  ;;  %vm4945_vm9 = vmpackc.low %vm5890_vm15, %vm5888_vm14  ;;  %vm5895_vm10 = vcmp.eq.s32.totalorder %v5889_v0, %v5855_v7  ;;  %v1689_v36 = vand.u32 4294901760, %v4933_v26  ;;  %v1701_v32 = vand.u32 4294901760, %v4937_v56  ;;  %vm5900_vm13 = vcmp.eq.s32.totalorder %v5899_v54, %v5849_v15  ;;  %v5908_v24 = vld [vmem:[#allocation44_spill] sm:$0xff]  ;;  %v5909_v34 = vld [vmem:[#allocation47_spill] sm:$0xff] }
 0x394   : > { %3066 = vmatprep.subr.msk.bf16.mxu1 %vm4890_vm3, %v5595_v3  ;;  %3162 = vmatprep.subr.msk.bf16.mxu0 %vm4890_vm3, %v5595_v3  ;;  %v5892_v41 = vsel %vm4945_vm9, 4294967295, %v5891_v41  ;;  %vm4972_vm11 = vmpackc.low %vm5895_vm10, %vm5894_vm7  ;;  %vm5902_vm6 = vcmp.eq.s32.totalorder %v5901_v30, %v5849_v15  ;;  %v5903_v12 = vmov 0  ;;  %v1678_v35 = vsub.f32 %v4897_v48, %v1677_v60  ;;  %v5910_v16 = vld [vmem:[#allocation49_spill] sm:$0xff]  ;;  %v5916_v23 = vld [vmem:[#allocation30_spill] sm:$0xff] }
 0x395   : > { %5893 = vst [vmem:[#allocation75_spill] sm:$0xff] %v5892_v41  ;;  %v5897_v55 = vsel %vm4972_vm11, 4294967295, %v5896_v55  ;;  %vm4985_vm2 = vmpackc.low %vm5902_vm6, %vm5900_vm13  ;;  %v4991_v33 = vsub.f32 %v1554_v37, %v4950_v31  ;;  %v1672_v6 = vsub.f32 %v4902_v61, %v1671_v46  ;;  %v4996_v52 = vsub.f32 %v5907_v5, %v5907_v5  ;;  %v5918_v51 = vld [vmem:[#allocation31_spill] sm:$0xff]  ;;  %v5923_v44 = vld [vmem:[#allocation46_spill] sm:$0xff] }
 0x396   : > { %5898 = vst [vmem:[#allocation76_spill] sm:$0xff] %v5897_v55  ;;  %v5904_v12 = vsel %vm4985_vm2, 4294967295, %v5903_v12  ;;  %v3565_v62 = vmov 0   ;;  %v1684_v18 = vsub.f32 %v4906_v59, %v1683_v27  ;;  %v5001_v19 = vsub.f32 %v5908_v24, %v5908_v24  ;;  %v5924_v49 = vld [vmem:[#allocation48_spill] sm:$0xff]  ;;  %v5925_v0 = vld [vmem:[#allocation51_spill] sm:$0xff] }
 0x397   : > { %3068 = vmatpush1.bf16.msk.msra.mxu1 %vm4926_vm4, %v5595_v3  ;;  %3164 = vmatpush1.bf16.msk.msra.mxu0 %vm4926_vm4, %v5595_v3  ;;  %5905 = vst [vmem:[#allocation77_spill] sm:$0xff] %v5904_v12  ;;  %5906 = vst [vmem:[#allocation78_spill] sm:$0xff] %v4991_v33  ;;  %v5005_v10 = vsub.f32 %v5909_v34, %v5909_v34  ;;  %v5015_v9 = vsub.f32 %v5910_v16, %v5910_v16  ;;  %v5913_v8 = vmov 0  ;;  %v1667_v45 = vand.u32 4294901760, %v1666_v29  ;;  %v5926_v29 = vld [vmem:[#allocation53_spill] sm:$0xff]  ;;  %v5934_v24 = vld [vmem:[#allocation35_spill] sm:$0xff] }
 0x398   : > { %3070 = vmatprep.subr.msk.bf16.mxu1 %vm4945_vm9, %v5595_v3  ;;  %3166 = vmatprep.subr.msk.bf16.mxu0 %vm4945_vm9, %v5595_v3  ;;  %vm5911_vm0 = vcmp.eq.s32.totalorder %v5899_v54, %v5855_v7  ;;  %vm5912_vm14 = vcmp.eq.s32.totalorder %v5901_v30, %v5855_v7  ;;  %v1690_v53 = vsub.f32 %v4933_v26, %v1689_v36  ;;  %v5920_v28 = vmov 0  ;;  %v5955_v43 = vld [vmem:[#allocation55_spill] sm:$0xff] }
 0x399   : > { %3381 = vset.pattern.permute.xlu0 %v3565_v62  ;;  %vm5029_vm15 = vmpackc.low %vm5912_vm14, %vm5911_vm0  ;;  %v1702_v22 = vsub.f32 %v4937_v56, %v1701_v32  ;;  %vm5917_vm7 = vcmp.eq.s32.totalorder %v5916_v23, %v5849_v15  ;;  %vm5919_vm10 = vcmp.eq.s32.totalorder %v5918_v51, %v5849_v15  ;;  %v1679_v25 = vand.u32 4294901760, %v1678_v35 }
 0x39a   : > { %1543 = vperm.xlu0 %3381, %v1540_v11   ;;  %v5914_v8 = vsel %vm5029_vm15, 4294967295, %v5913_v8  ;;  %vm5041_vm13 = vmpackc.low %vm5919_vm10, %vm5917_vm7  ;;  %v5594_v14 = vand.u32 4294901760, %v4991_v33  ;;  %v1673_v13 = vand.u32 4294901760, %v1672_v6  ;;  %v1695_v40 = vand.u32 4294901760, %v4996_v52 }
 0x39b   : > { %3072 = vmatpush1.bf16.msk.msra.mxu1 %vm4972_vm11, %v5595_v3  ;;  %3168 = vmatpush1.bf16.msk.msra.mxu0 %vm4972_vm11, %v5595_v3  ;;  %5915 = vst [vmem:[#allocation79_spill] sm:$0xff] %v5914_v8  ;;  %v5921_v28 = vsel %vm5041_vm13, 4294967295, %v5920_v28  ;;  %v1685_v57 = vand.u32 4294901760, %v1684_v18  ;;  %v1707_v17 = vand.u32 4294901760, %v5001_v19  ;;  %v1713_v37 = vand.u32 4294901760, %v5005_v10  ;;  %v5932_v18 = vld [vmem:[#allocation34_spill] sm:$0xff] }
 0x39c   : > { %3074 = vmatprep.subr.msk.bf16.mxu1 %vm4985_vm2, %v5595_v3  ;;  %3170 = vmatprep.subr.msk.bf16.mxu0 %vm4985_vm2, %v5595_v3  ;;  %5922 = vst [vmem:[#allocation80_spill] sm:$0xff] %v5921_v28  ;;  %v5051_v20 = vsub.f32 %v5923_v44, %v5923_v44  ;;  %v1725_v63 = vand.u32 4294901760, %v5015_v9  ;;  %v5062_v2 = vsub.f32 %v5924_v49, %v5924_v49  ;;  %v5929_v30 = vmov 0  ;;  %v5946_v49 = vld [vmem:[#allocation52_spill] sm:$0xff]  ;;  %v5965_v28 = vld [vmem:[#allocation54_spill] sm:$0xff] }
 0x39d   : > { %v5066_v11 = vsub.f32 %v5925_v0, %v5925_v0  ;;  %v5070_v54 = vsub.f32 %v5926_v29, %v5926_v29  ;;  %vm5927_vm6 = vcmp.eq.s32.totalorder %v5916_v23, %v5855_v7  ;;  %vm5928_vm0 = vcmp.eq.s32.totalorder %v5918_v51, %v5855_v7  ;;  %v5948_v29 = vld [vmem:[#allocation36_spill] sm:$0xff] }
 0x39e   : > { %vm5084_vm14 = vmpackc.low %vm5928_vm0, %vm5927_vm6  ;;  %v3185_v35 = vpack.c.bf16 %v1677_v60, %v1665_v21  ;;  %v5088_v6 = vpack.c.bf16 %v1683_v27, %v1671_v46  ;;  %v1691_v5 = vand.u32 4294901760, %v1690_v53  ;;  %v1703_v62 = vand.u32 4294901760, %v1702_v22 }
 0x39f   : > { %3076 = vmatpush1.bf16.msk.msra.mxu1 %vm5029_vm15, %v5595_v3  ;;  %3172 = vmatpush1.bf16.msk.msra.mxu0 %vm5029_vm15, %v5595_v3  ;;  %v5930_v30 = vsel %vm5084_vm14, 4294967295, %v5929_v30  ;;  %vm5933_vm7 = vcmp.eq.s32.totalorder %v5932_v18, %v5849_v15  ;;  %vm5935_vm10 = vcmp.eq.s32.totalorder %v5934_v24, %v5849_v15  ;;  %v5936_v34 = vmov 0 }
 0x3a0   : > { %3078 = vmatprep.subr.msk.bf16.mxu1 %vm5041_vm13, %v5595_v3  ;;  %3174 = vmatprep.subr.msk.bf16.mxu0 %vm5041_vm13, %v5595_v3  ;;  %5931 = vst [vmem:[#allocation81_spill] sm:$0xff] %v5930_v30  ;;  %vm5096_vm13 = vmpackc.low %vm5935_vm10, %vm5933_vm7  ;;  %v3089_v16 = vpack.c.bf16 %v1679_v25, %v1667_v45  ;;  %v5103_v23 = vsub.f32 %v4991_v33, %v5594_v14  ;;  %v1719_v22 = vand.u32 4294901760, %v5051_v20  ;;  %v1737_v45 = vand.u32 4294901760, %v5066_v11  ;;  %v5957_v14 = vld [vmem:[#allocation57_spill] sm:$0xff] }
 0x3a1   : > { %v5937_v34 = vsel %vm5096_vm13, 4294967295, %v5936_v34  ;;  %v5105_v21 = vpack.c.bf16 %v1701_v32, %v1689_v36  ;;  %v1696_v60 = vsub.f32 %v4996_v52, %v1695_v40  ;;  %v5108_v46 = vpack.c.bf16 %v1685_v57, %v1673_v13  ;;  %v5944_v57 = vld [vmem:[#allocation50_spill] sm:$0xff] }
 0x3a2   : > { %5938 = vst [vmem:[#allocation82_spill] sm:$0xff] %v5937_v34  ;;  %v1708_v27 = vsub.f32 %v5001_v19, %v1707_v17  ;;  %v1714_v53 = vsub.f32 %v5005_v10, %v1713_v37  ;;  %v1726_v36 = vsub.f32 %v5015_v9, %v1725_v63  ;;  %v1731_v32 = vand.u32 4294901760, %v5062_v2 }
 0x3a3   : > { %3080 = vmatpush1.bf16.msk.msra.mxu1 %vm5084_vm14, %v5595_v3  ;;  %3176 = vmatpush1.bf16.msk.msra.mxu0 %vm5084_vm14, %v5595_v3  ;;  %v1749_v51 = vand.u32 4294901760, %v5070_v54  ;;  %vm5939_vm6 = vcmp.eq.s32.totalorder %v5932_v18, %v5855_v7  ;;  %vm5940_vm0 = vcmp.eq.s32.totalorder %v5934_v24, %v5855_v7  ;;  %v5941_v25 = vmov 0  ;;  %v5950_v18 = vld [vmem:[#allocation37_spill] sm:$0xff] }
 0x3a4   : > { %3082 = vmatprep.subr.msk.bf16.mxu1 %vm5096_vm13, %v5595_v3  ;;  %3178 = vmatprep.subr.msk.bf16.mxu0 %vm5096_vm13, %v5595_v3  ;;  %vm5135_vm7 = vmpackc.low %vm5940_vm0, %vm5939_vm6  ;;  %v3093_v13 = vpack.c.bf16 %v1703_v62, %v1691_v5  ;;  %v5141_v44 = vsub.f32 %v5944_v57, %v5944_v57  ;;  %v5145_v0 = vsub.f32 %v5946_v49, %v5946_v49  ;;  %v5952_v24 = vmov 0 }
 0x3a5   : > { %v5942_v25 = vsel %vm5135_vm7, 4294967295, %v5941_v25  ;;  %vm5949_vm10 = vcmp.eq.s32.totalorder %v5948_v29, %v5849_v15  ;;  %vm5951_vm13 = vcmp.eq.s32.totalorder %v5950_v18, %v5849_v15  ;;  %v1656_v5 = vand.u32 4294901760, %v5103_v23 }
 0x3a6   : > { %5943 = vst [vmem:[#allocation83_spill] sm:$0xff] %v5942_v25  ;;  %5945 = vst [vmem:[#allocation84_spill] sm:$0xff] %v5141_v44  ;;  %v1697_v62 = vand.u32 4294901760, %v1696_v60  ;;  %v5160_v57 = vsub.f32 %v5955_v43, %v5955_v43  ;;  %v5164_v49 = vsub.f32 %v5957_v14, %v5957_v14  ;;  %v1709_v3 = vand.u32 4294901760, %v1708_v27 }
 0x3a7   : > { %5947 = vst [vmem:[#allocation85_spill] sm:$0xff] %v5145_v0  ;;  %vm5153_vm14 = vmpackc.low %vm5951_vm13, %vm5949_vm10  ;;  %v5166_v38 = vpack.c.bf16 %v1707_v17, %v1695_v40  ;;  %v1715_v34 = vand.u32 4294901760, %v1714_v53  ;;  %v1720_v15 = vsub.f32 %v5051_v20, %v1719_v22  ;;  %v5959_v30 = vmov 1.0|1.0  }
 0x3a8   : > { %v5953_v24 = vsel %vm5153_vm14, 4294967295, %v5952_v24  ;;  %5956 = vst [vmem:[#allocation87_spill] sm:$0xff] %v5160_v57  ;;  %5958 = vst [vmem:[#allocation88_spill] sm:$0xff] %v5164_v49  ;;  %3084 = vmatpush1.bf16.msk.msra.mxu1 %vm5135_vm7, %v5959_v30  ;;  %3180 = vmatpush1.bf16.msk.msra.mxu0 %vm5135_vm7, %v5959_v30  ;;  %v1727_v43 = vand.u32 4294901760, %v1726_v36  ;;  %v1732_v23 = vsub.f32 %v5062_v2, %v1731_v32  ;;  %v5962_v40 = vmov 0 }
 0x3a9   : > { %5954 = vst [vmem:[#allocation86_spill] sm:$0xff] %v5953_v24  ;;  %v1738_v14 = vsub.f32 %v5066_v11, %v1737_v45  ;;  %v1750_v60 = vsub.f32 %v5070_v54, %v1749_v51  ;;  %3086 = vmatprep.subr.msk.bf16.mxu1 %vm5153_vm14, %v5959_v30  ;;  %3182 = vmatprep.subr.msk.bf16.mxu0 %vm5153_vm14, %v5959_v30  ;;  %v1743_v53 = vand.u32 4294901760, %v5141_v44  ;;  %v1755_v36 = vand.u32 4294901760, %v5145_v0 }
 0x3aa   : > { %vm5960_vm13 = vcmp.eq.s32.totalorder %v5948_v29, %v5855_v7  ;;  %vm5961_vm6 = vcmp.eq.s32.totalorder %v5950_v18, %v5855_v7  ;;  %v3193_v17 = vpack.c.bf16 %v1725_v63, %v1713_v37  ;;  %v5194_v27 = vpack.c.bf16 %v1731_v32, %v1719_v22  ;;  %v5967_v7 = vld [vmem:[#allocation56_spill] sm:$0xff]  ;;  %v5969_v63 = vld [vmem:[#allocation59_spill] sm:$0xff]  ;;  %v5971_v32 = vld [vmem:[#allocation61_spill] sm:$0xff] }
 0x3ab   : > { %vm5190_vm0 = vmpackc.low %vm5961_vm6, %vm5960_vm13  ;;  %v1761_v24 = vand.u32 4294901760, %v5160_v57  ;;  %v1773_v25 = vand.u32 4294901760, %v5164_v49  ;;  %v5202_v29 = vsub.f32 %v5965_v28, %v5965_v28  ;;  %v5206_v18 = vsub.f32 %v5967_v7, %v5967_v7 }
 0x3ac   : > { %v5963_v40 = vsel %vm5190_vm0, 4294967295, %v5962_v40  ;;  %v3095_v8 = vpack.c.bf16 %v1709_v3, %v1697_v62  ;;  %v1721_v37 = vand.u32 4294901760, %v1720_v15  ;;  %v5210_v22 = vsub.f32 %v5969_v63, %v5969_v63  ;;  %3088 = vmatpush1.bf16.msk.msra.mxu1 %vm5190_vm0, %v5959_v30  ;;  %3184 = vmatpush1.bf16.msk.msra.mxu0 %vm5190_vm0, %v5959_v30 }
 0x3ad   : > { %5964 = vst [vmem:[#allocation89_spill] sm:$0xff] %v5963_v40  ;;  %5966 = vst [vmem:[#allocation90_spill] sm:$0xff] %v5202_v29  ;;  %v5214_v12 = vsub.f32 %v5971_v32, %v5971_v32  ;;  %v3097_v28 = vpack.c.bf16 %v1727_v43, %v1715_v34  ;;  %v1733_v7 = vand.u32 4294901760, %v1732_v23  ;;  %v1739_v3 = vand.u32 4294901760, %v1738_v14  ;;  %3090 = vmatprep.subr.bf16.mxu1 %v3089_v16  ;;  %v5976_v43 = vld [vmem:[#allocation60_spill] sm:$0xff] }
 0x3ae   : > { %5968 = vst [vmem:[#allocation91_spill] sm:$0xff] %v5206_v18  ;;  %5970 = vst [vmem:[#allocation92_spill] sm:$0xff] %v5210_v22  ;;  %v1751_v62 = vand.u32 4294901760, %v1750_v60  ;;  %3186 = vmatprep.subr.bf16.mxu0 %v3185_v35  ;;  %v3197_v15 = vpack.c.bf16 %v1749_v51, %v1737_v45  ;;  %v1744_v63 = vsub.f32 %v5141_v44, %v1743_v53  ;;  %v1767_v4 = vand.u32 4294901760, %v5202_v29  ;;  %v5974_v45 = vld [vmem:[#allocation58_spill] sm:$0xff] }
 0x3af   : > { %5972 = vst [vmem:[#allocation93_spill] sm:$0xff] %v5214_v12  ;;  %v1756_v32 = vsub.f32 %v5145_v0, %v1755_v36  ;;  %v1762_v55 = vsub.f32 %v5160_v57, %v1761_v24  ;;  %v1774_v41 = vsub.f32 %v5164_v49, %v1773_v25  ;;  %v1779_v40 = vand.u32 4294901760, %v5206_v18  ;;  %1657 = vmatmul.mubr.f32.vlgmr.msra.gmra.mrb[0].mxu1 %v1656_v5  ;;  %v5978_v49 = vld [vmem:[#allocation63_spill] sm:$0xff]  ;;  %v5980_v57 = vld [vmem:[#allocation65_spill] sm:$0xff]  ;;  %v5987_v44 = vld [vmem:[#allocation66_spill] sm:$0xff] }
 0x3b0   : > { %v5973_v34 = vand.u32 4294901760, %v4991_v33  ;;  %v1785_v16 = vand.u32 4294901760, %v5210_v22  ;;  %v1797_v35 = vand.u32 4294901760, %v5214_v12  ;;  %v5234_v51 = vsub.f32 %v5974_v45, %v5974_v45  ;;  %3092 = vmatpush1.bf16.msra.mxu1 %v5108_v46 }
 0x3b1   : > { %v5238_v23 = vsub.f32 %v5976_v43, %v5976_v43  ;;  %v3099_v5 = vpack.c.bf16 %v1733_v7, %v1721_v37  ;;  %v3101_v14 = vpack.c.bf16 %v1751_v62, %v1739_v3  ;;  %v3199_v60 = vpack.c.bf16 %v1755_v36, %v1743_v53  ;;  %3094 = vmatprep.subr.bf16.mxu1 %v3093_v13  ;;  %v5984_v7 = vld [vmem:[#allocation64_spill] sm:$0xff] }
 0x3b2   : > { %2132 = vmatmul.mubr.f32.vlgmr.msra.gmra.mrb[0].mxu0 %v5973_v34  ;;  %5975 = vst [vmem:[#allocation94_spill] sm:$0xff] %v5234_v51  ;;  %v1745_v34 = vand.u32 4294901760, %v1744_v63  ;;  %v1757_v33 = vand.u32 4294901760, %v1756_v32  ;;  %v5245_v45 = vsub.f32 %v5978_v49, %v5978_v49  ;;  %v5249_v43 = vsub.f32 %v5980_v57, %v5980_v57  ;;  %v5985_v32 = vld [vmem:[#allocation67_spill] sm:$0xff] }
 0x3b3   : > { %5977 = vst [vmem:[#allocation95_spill] sm:$0xff] %v5238_v23  ;;  %3188 = vmatpush1.bf16.msra.mxu0 %v5088_v6  ;;  %v1763_v0 = vand.u32 4294901760, %v1762_v55  ;;  %v1775_v46 = vand.u32 4294901760, %v1774_v41  ;;  %v1768_v6 = vsub.f32 %v5202_v29, %v1767_v4  ;;  %v1780_v37 = vsub.f32 %v5206_v18, %v1779_v40  ;;  %v5983_v55 = vld [vmem:[#allocation62_spill] sm:$0xff] }
 0x3b4   : > { %3190 = vmatprep.subr.bf16.mxu0 %v5105_v21  ;;  %5979 = vst [vmem:[#allocation96_spill] sm:$0xff] %v5245_v45  ;;  %5981 = vst [vmem:[#allocation97_spill] sm:$0xff] %v5249_v43  ;;  %v5982_v53 = vmov 0.0   ;;  %v1786_v21 = vsub.f32 %v5210_v22, %v1785_v16  ;;  %v1798_v13 = vsub.f32 %v5214_v12, %v1797_v35  ;;  %v1791_v49 = vand.u32 4294901760, %v5234_v51  ;;  %3096 = vmatpush1.bf16.msra.mxu1 %v3095_v8 }
 0x3b5   : > { %1887 = vmatprep.mubr.f32.mxu1 %v5982_v53  ;;  %2298 = vmatprep.mubr.f32.mxu0 %v5982_v53  ;;  %v1803_v36 = vand.u32 4294901760, %v5238_v23  ;;  %v3201_v41 = vpack.c.bf16 %v1773_v25, %v1761_v24  ;;  %v5262_v57 = vsub.f32 %v5983_v55, %v5983_v55  ;;  %v5266_v3 = vsub.f32 %v5984_v7, %v5984_v7 }
 0x3b6   : > { %3098 = vmatprep.subr.bf16.mxu1 %v3097_v28  ;;  %v1809_v62 = vand.u32 4294901760, %v5245_v45  ;;  %v1821_v63 = vand.u32 4294901760, %v5249_v43  ;;  %v5272_v8 = vsub.f32 %v5985_v32, %v5985_v32  ;;  %v3103_v24 = vpack.c.bf16 %v1757_v33, %v1745_v34  ;;  %v5988_v33 = vld [vmem:[#allocation68_spill] sm:$0xff] }
 0x3b7   : > { %3192 = vmatpush1.bf16.msra.mxu0 %v5166_v38  ;;  %v5986_v38 = vld [vmem:[#allocation69_spill] sm:$0xff]  ;;  %v3105_v55 = vpack.c.bf16 %v1775_v46, %v1763_v0  ;;  %v1769_v12 = vand.u32 4294901760, %v1768_v6  ;;  %v1781_v22 = vand.u32 4294901760, %v1780_v37  ;;  %v1787_v7 = vand.u32 4294901760, %v1786_v21 }
 0x3b8   : > { %3194 = vmatprep.subr.bf16.mxu0 %v3193_v17  ;;  %v5276_v25 = vsub.f32 %v5986_v38, %v5986_v38  ;;  %v1799_v18 = vand.u32 4294901760, %v1798_v13  ;;  %v1792_v17 = vsub.f32 %v5234_v51, %v1791_v49  ;;  %v1804_v28 = vsub.f32 %v5238_v23, %v1803_v36  ;;  %3100 = vmatpush1.bf16.msra.mxu1 %v3099_v5 }
 0x3b9   : > { %v1815_v32 = vand.u32 4294901760, %v5262_v57  ;;  %v1827_v29 = vand.u32 4294901760, %v5266_v3  ;;  %v5285_v38 = vsub.f32 %v5987_v44, %v5987_v44  ;;  %v5289_v0 = vsub.f32 %v5988_v33, %v5988_v33  ;;  %3102 = vmatprep.subr.bf16.mxu1 %v3101_v14 }
 0x3ba   : > { %v1810_v34 = vsub.f32 %v5245_v45, %v1809_v62  ;;  %v1822_v5 = vsub.f32 %v5249_v43, %v1821_v63  ;;  %v1845_v46 = vand.u32 4294901760, %v5276_v25  ;;  %v3107_v6 = vpack.c.bf16 %v1781_v22, %v1769_v12 }
 0x3bb   : > { %3196 = vmatpush1.bf16.msra.mxu0 %v5194_v27  ;;  %v1833_v27 = vand.u32 4294901760, %v5272_v8  ;;  %v3203_v37 = vpack.c.bf16 %v1779_v40, %v1767_v4  ;;  %v3109_v21 = vpack.c.bf16 %v1799_v18, %v1787_v7  ;;  %v3205_v13 = vpack.c.bf16 %v1797_v35, %v1785_v16 }
 0x3bc   : > { %3198 = vmatprep.subr.bf16.mxu0 %v3197_v15  ;;  %v1793_v44 = vand.u32 4294901760, %v1792_v17  ;;  %v1805_v23 = vand.u32 4294901760, %v1804_v28  ;;  %3104 = vmatpush1.bf16.msra.mxu1 %v3103_v24  ;;  %v1816_v33 = vsub.f32 %v5262_v57, %v1815_v32  ;;  %v1828_v15 = vsub.f32 %v5266_v3, %v1827_v29 }
 0x3bd   : > { %v1839_v14 = vand.u32 4294901760, %v5285_v38  ;;  %v1851_v43 = vand.u32 4294901760, %v5289_v0  ;;  %3106 = vmatprep.subr.bf16.mxu1 %v3105_v55  ;;  %v1811_v45 = vand.u32 4294901760, %v1810_v34  ;;  %v1823_v51 = vand.u32 4294901760, %v1822_v5 }
 0x3be   : > { %v1834_v4 = vsub.f32 %v5272_v8, %v1833_v27  ;;  %v1846_v12 = vsub.f32 %v5276_v25, %v1845_v46  ;;  %v3111_v40 = vpack.c.bf16 %v1805_v23, %v1793_v44  ;;  %v3207_v18 = vpack.c.bf16 %v1803_v36, %v1791_v49 }
 0x3bf   : > { %3200 = vmatpush1.bf16.msra.mxu0 %v3199_v60  ;;  %v1817_v22 = vand.u32 4294901760, %v1816_v33  ;;  %v1829_v16 = vand.u32 4294901760, %v1828_v15  ;;  %v1840_v35 = vsub.f32 %v5285_v38, %v1839_v14  ;;  %v1852_v60 = vsub.f32 %v5289_v0, %v1851_v43  ;;  %v6010_v33 = vld [vmem:[#allocation82_spill] sm:$0xff] }
 0x3c0   : > { %3202 = vmatprep.subr.bf16.mxu0 %v3201_v41  ;;  %3108 = vmatpush1.bf16.msra.mxu1 %v3107_v6  ;;  %v3113_v24 = vpack.c.bf16 %v1823_v51, %v1811_v45  ;;  %v3209_v41 = vpack.c.bf16 %v1821_v63, %v1809_v62  ;;  %v1835_v55 = vand.u32 4294901760, %v1834_v4  ;;  %v1847_v7 = vand.u32 4294901760, %v1846_v12  ;;  %v6002_v62 = vld [vmem:[#allocation94_spill] sm:$0xff]  ;;  %v6003_v63 = vld [vmem:[#allocation95_spill] sm:$0xff] }
 0x3c1   : > { %3110 = vmatprep.subr.bf16.mxu1 %v3109_v21  ;;  %v3115_v17 = vpack.c.bf16 %v1829_v16, %v1817_v22  ;;  %v3211_v28 = vpack.c.bf16 %v1827_v29, %v1815_v32  ;;  %v1841_v23 = vand.u32 4294901760, %v1840_v35  ;;  %v1853_v49 = vand.u32 4294901760, %v1852_v60  ;;  %v6017_v12 = vld [vmem:[#allocation18_spill] sm:$0xff]  ;;  %v1539_v60 = vld [vmem:[%s1538_s19] sm:$0x3] }
 0x3c2   : > { %v3117_v36 = vpack.c.bf16 %v1847_v7, %v1835_v55  ;;  %v3213_v34 = vpack.c.bf16 %v1845_v46, %v1833_v27  ;;  %v3215_v6 = vpack.c.bf16 %v1851_v43, %v1839_v14  ;;  %v3121_v51 = vpack.c.bf16 %v4897_v48, %v4882_v39  ;;  %v6004_v27 = vld [vmem:[#allocation80_spill] sm:$0xff] }
 0x3c3   : > { %3204 = vmatpush1.bf16.msra.mxu0 %v3203_v37  ;;  %v3119_v5 = vpack.c.bf16 %v1853_v49, %v1841_v23  ;;  %v3123_v29 = vpack.c.bf16 %v4906_v59, %v4902_v61  ;;  %v3125_v45 = vpack.c.bf16 %v4937_v56, %v4933_v26  ;;  %v3127_v39 = vpack.c.bf16 %v5001_v19, %v4996_v52  ;;  %v5990_v61 = vld [vmem:[#allocation84_spill] sm:$0xff]  ;;  %v5991_v59 = vld [vmem:[#allocation85_spill] sm:$0xff]  ;;  %v5993_v56 = vld [vmem:[#allocation87_spill] sm:$0xff] }
 0x3c4   : > { %3206 = vmatprep.subr.bf16.mxu0 %v3205_v13  ;;  %3112 = vmatpush1.bf16.msra.mxu1 %v3111_v40  ;;  %v3129_v58 = vpack.c.bf16 %v5015_v9, %v5005_v10  ;;  %v3131_v50 = vpack.c.bf16 %v5062_v2, %v5051_v20  ;;  %v3133_v47 = vpack.c.bf16 %v5070_v54, %v5066_v11  ;;  %v5994_v52 = vld [vmem:[#allocation88_spill] sm:$0xff]  ;;  %v5996_v10 = vld [vmem:[#allocation90_spill] sm:$0xff]  ;;  %v5997_v9 = vld [vmem:[#allocation91_spill] sm:$0xff] }
 0x3c5   : > { %3114 = vmatprep.subr.bf16.mxu1 %v3113_v24  ;;  %v3135_v42 = vpack.c.bf16 %v5991_v59, %v5990_v61  ;;  %v3137_v1 = vpack.c.bf16 %v5994_v52, %v5993_v56  ;;  %v3139_v20 = vpack.c.bf16 %v5997_v9, %v5996_v10  ;;  %v5999_v11 = vld [vmem:[#allocation92_spill] sm:$0xff]  ;;  %v6000_v54 = vld [vmem:[#allocation93_spill] sm:$0xff]  ;;  %v3143_v32 = vpack.c.bf16 %v6003_v63, %v6002_v62 }
 0x3c6   : > { %v3141_v43 = vpack.c.bf16 %v6000_v54, %v5999_v11  ;;  %v6006_v46 = vld [vmem:[#allocation96_spill] sm:$0xff]  ;;  %v6007_v37 = vld [vmem:[#allocation97_spill] sm:$0xff]  ;;  %v3147_v44 = vpack.c.bf16 %v5266_v3, %v5262_v57  ;;  %v3149_v15 = vpack.c.bf16 %v5276_v25, %v5272_v8  ;;  %v3151_v4 = vpack.c.bf16 %v5289_v0, %v5285_v38  ;;  %v6015_v8 = vld [vmem:[#allocation78_spill] sm:$0xff] }
 0x3c7   : > { %3208 = vmatpush1.bf16.msra.mxu0 %v3207_v18  ;;  %v3145_v21 = vpack.c.bf16 %v6007_v37, %v6006_v46  ;;  %v6008_v13 = vld [vmem:[#allocation81_spill] sm:$0xff]  ;;  %v6016_v25 = vld [vmem:[#allocation24_spill] sm:$0xff] }
 0x3c8   : > { %3210 = vmatprep.subr.bf16.mxu0 %v3209_v41  ;;  %3116 = vmatpush1.bf16.msra.mxu1 %v3115_v17  ;;  %v2470_v40 = vrot.slane %v6017_v12, %v6016_v25  ;;  %v6018_v38 = vld [vmem:[#allocation25_spill] sm:$0xff]  ;;  %v3566_v41 = vmov 1966171168  }
 0x3c9   : > { %3118 = vmatprep.subr.bf16.mxu1 %v3117_v36  ;;  %v2474_v0 = vrot.slane %v6017_v12, %v6018_v38  ;;  %v2414_v55 = vunpack.c.l.s4 %v3566_v41 }
 0x3cb   : > { %3212 = vmatpush1.bf16.msra.mxu0 %v3211_v28  ;;  %v2415_v7 = vunpack.c.0.s8 %v2414_v55 }
 0x3cc   : > { %3214 = vmatprep.subr.bf16.mxu0 %v3213_v34  ;;  %3120 = vmatpush1.bf16.msra.mxu1 %v3119_v5  ;;  %v6019_v5 = vld [vmem:[#allocation17_spill] sm:$0xff] }
 0x3cd   : > { %3122 = vmatprep.subr.bf16.mxu1 %v3121_v51 }
 0x3cf   : > { %3216 = vmatpush1.bf16.msra.mxu0 %v3215_v6  ;;  %1889 = vmatmul.mubr.f32.vlgmr.msra.gmra.mrb[0].mxu1 %v4950_v31  ;;  %v2418_v6 = vsub.s32 %v2415_v7, %v6019_v5 }
 0x3d0   : > { %3218 = vmatprep.subr.msk.bf16.mxu0 %vm4828_vm5, %v5959_v30  ;;  %3124 = vmatpush1.bf16.msra.mxu1 %v3123_v29  ;;  %vm6005_vm5 = vnez %v6004_v27 }
 0x3d1   : > { %3126 = vmatprep.subr.bf16.mxu1 %v3125_v45  ;;  %2023 = vmatprep.mubr.f32.mxu1 %v5982_v53 }
 0x3d2   : > { %2300 = vmatmul.mubr.f32.vlgmr.msra.gmra.mrb[0].mxu0 %v4950_v31 }
 0x3d3   : > { %3220 = vmatpush1.bf16.msk.msra.mxu0 %vm4844_vm8, %v5959_v30  ;;  %2402 = vmatprep.mubr.f32.mxu0 %v5982_v53  ;;  %vm6009_vm8 = vnez %v6008_v13  ;;  %v2465_v13 = vld [vmem:[#allocation6] sm:$0x1] }
 0x3d4   : > { %3222 = vmatprep.subr.msk.bf16.mxu0 %vm4860_vm12, %v5959_v30  ;;  %3128 = vmatpush1.bf16.msra.mxu1 %v3127_v39  ;;  %vm6011_vm12 = vnez %v6010_v33 }
 0x3d5   : > { %3130 = vmatprep.subr.bf16.mxu1 %v3129_v58 }
 0x3d7   : > { %3224 = vmatpush1.bf16.msk.msra.mxu0 %vm4876_vm1, %v5959_v30  ;;  %vm2448_vm1 = vcmask 1040384  }
 0x3d8   : > { %3226 = vmatprep.subr.msk.bf16.mxu0 %vm4890_vm3, %v5959_v30  ;;  %3132 = vmatpush1.bf16.msra.mxu1 %v3131_v50  ;;  %v2477_v18 = vsel %vm2448_vm1, %v2470_v40, 0.0  ;;  %v2478_v22 = vsel %vm2448_vm1, %v2474_v0, 0.0  ;;  %vm2435_vm3 = vcmp.gt.f32.partialorder %v6017_v12, 0.5 }
 0x3d9   : > { %3134 = vmatprep.subr.bf16.mxu1 %v3133_v47  ;;  %v2479_v16 = vadd.f32 %v2478_v22, %v2477_v18 }
 0x3db   : > { %3228 = vmatpush1.bf16.msk.msra.mxu0 %vm4926_vm4, %v5959_v30  ;;  %2480 = vadd.xlane.f32.xlu1 %v2479_v16  ;;  %vm2463_vm4 = vcmask 0  }
 0x3dc   : > { %3230 = vmatprep.subr.msk.bf16.mxu0 %vm4945_vm9, %v5959_v30  ;;  %3136 = vmatpush1.bf16.msra.mxu1 %v3135_v42 }
 0x3dd   : > { %3138 = vmatprep.subr.bf16.mxu1 %v3137_v1 }
 0x3df   : > { %3232 = vmatpush1.bf16.msk.msra.mxu0 %vm4972_vm11, %v5959_v30 }
 0x3e0   : > { %3234 = vmatprep.subr.msk.bf16.mxu0 %vm4985_vm2, %v5959_v30  ;;  %3140 = vmatpush1.bf16.msra.mxu1 %v3139_v20 }
 0x3e1   : > { %3142 = vmatprep.subr.bf16.mxu1 %v3141_v43 }
 0x3e3   : > { %3236 = vmatpush1.bf16.msk.msra.mxu0 %vm5029_vm15, %v5959_v30 }
 0x3e4   : > { %3238 = vmatprep.subr.msk.bf16.mxu0 %vm6005_vm5, %v5959_v30  ;;  %3144 = vmatpush1.bf16.msra.mxu1 %v3143_v32 }
 0x3e5   : > { %3146 = vmatprep.subr.bf16.mxu1 %v3145_v21  ;;  %v2434_v21 = vld [vmem:[#allocation5] sm:$0x1] }
 0x3e7   : > { %3240 = vmatpush1.bf16.msk.msra.mxu0 %vm6009_vm8, %v5959_v30 }
 0x3e8   : > { %3242 = vmatprep.subr.msk.bf16.mxu0 %vm6011_vm12, %v5959_v30  ;;  %3148 = vmatpush1.bf16.msra.mxu1 %v3147_v44 }
 0x3e9   : > { %3150 = vmatprep.subr.bf16.mxu1 %v3149_v15 }
 0x3eb   : > { %3244 = vmatpush1.bf16.msk.msra.mxu0 %vm5135_vm7, %v5959_v30 }
 0x3ec   : > { %3246 = vmatprep.subr.msk.bf16.mxu0 %vm5153_vm14, %v5959_v30  ;;  %3152 = vmatpush1.bf16.msra.mxu1 %v3151_v4 }
 0x3ef   : > { %3248 = vmatpush1.bf16.msk.msra.mxu0 %vm5190_vm0, %v5959_v30  ;;  %2026 = vmatmul.mubr.f32.vlgmr.msra.gmra.mrb[0].mxu1 %v6015_v8 }
 0x3f2   : > { %2404 = vmatmul.mubr.f32.vlgmr.msra.gmra.mrb[0].mxu0 %v4950_v31 }
 0x419   : > { %v1544_v35 = vpop.permute.xlu0 %1543 }
 0x41a   : > { %v1549_v30 = vrot.slane %v1544_v35, %v6016_v25 }
 0x41c   : > { %v1550_v24 = vsub.f32 %v1539_v60, %v1549_v30 }
 0x41e   : > { %v1551_v31 = vmul.f32 1.442695, %v1550_v24 }
 0x420   : > { %3382 = vpow2.f32 %v1551_v31 }
 0x42a   : > { %v3383_v45 = vpop.eup %3382 }
 0x468   : > { %v2481_v10 = vpop.xlane.xlu1 %2480 }
 0x469   : > { %v2482_v9 = vrot.slane %v2481_v10, 4 }
 0x46b   : > { %v2483_v20 = vadd.f32 %v2482_v9, %v2481_v10 }
 0x46d   : > { %v2484_v2 = vrot.slane %v2483_v20, 2 }
 0x46f   : > { %v2485_v53 = vadd.f32 %v2484_v2, %v2483_v20 }
 0x471   : > { %v2486_v32 = vrot.slane %v2485_v53, 1 }
 0x473   : > { %v2487_v37 = vadd.f32 %v2486_v32, %v2485_v53 }
 0x4c2   : > { %v2027_v17 = vpop.f32.mrb[0].mxu1 }
 0x4c3   : > { %v2029_v49 = vpop.f32.mrb[1].mxu1 }
 0x4c5   : > { %v2405_v28 = vpop.f32.mrb[0].mxu0 }
 0x4c6   : > { %v3249_v23 = vadd.f32 %v2405_v28, %v2027_v17  ;;  %v2407_v36 = vpop.f32.mrb[1].mxu0 }
 0x4c7   : > { %v3250_v34 = vadd.f32 %v2407_v36, %v2029_v49 }
 0x4c9   : > { %v2412_v51 = vcombine.low %v3249_v23, %v3250_v34 }
 0x4cb   : > { %v2419_v29 = vrot.slane %v2412_v51, %v2418_v6 }
 0x4cd   : > { %v2426_v39 = vrot.slane %v2419_v29, %v2418_v6 }
 0x4cf   : > { %v2428_v58 = vadd.f32 %v3383_v45, %v2426_v39 }
 0x4d1   : > { %3384 = vrcp.f32 %v2428_v58 }
 0x4db   : > { %v3385_v50 = vpop.eup %3384 }
 0x4dc   : > { %v2430_v47 = vmul.f32 %v3385_v50, %v3383_v45 }
 0x4de   : > { %3386 = vlog2.f32 %v2430_v47 }
 0x4e8   : > { %v3387_v48 = vpop.eup %3386 }
 0x4e9   : > { %v2432_v61 = vmul.f32 0.6931472, %v3387_v48 }
 0x4eb   : > { %v2433_v59 = vsub.f32 0.0, %v2432_v61 }
 0x4ed   : > { %v2436_v42 = vsel %vm2435_vm3, %v2433_v59, 0.0 }
 0x4ee   : > { %v2441_v26 = vrot.slane %v2436_v42, %v6016_v25  ;;  %v2445_v56 = vrot.slane %v2436_v42, %v6018_v38 }
 0x4f0   : > { %v2449_v52 = vsel %vm2448_vm1, %v2441_v26, 0.0  ;;  %v2450_v1 = vsel %vm2448_vm1, %v2445_v56, 0.0 }
 0x4f1   : > { %v2451_v19 = vadd.f32 %v2450_v1, %v2449_v52 }
 0x4f3   : > { %2452 = vadd.xlane.f32.xlu0 %v2451_v19 }
 0x580   : > { %v2453_v11 = vpop.xlane.xlu0 %2452 }
 0x581   : > { %v2454_v54 = vrot.slane %v2453_v11, 4 }
 0x583   : > { %v2455_v43 = vadd.f32 %v2454_v54, %v2453_v11 }
 0x585   : > { %v2456_v62 = vrot.slane %v2455_v43, 2 }
 0x587   : > { %v2457_v63 = vadd.f32 %v2456_v62, %v2455_v43 }
 0x589   : > { %v2458_v27 = vrot.slane %v2457_v63, 1 }
 0x58b   : > { %v2459_v46 = vadd.f32 %v2458_v27, %v2457_v63 }
 0x58d   : > { %3261 = vpush %v2459_v46 }
 0x58e   : > { %3263 = vpush %v2487_v37 }
 0x5bd   : > { %2495 = sbr.rel (%p2858_p11) target bundleno = 1497 (0x5d9), region = 60 }
 0x5be   : > { %s3262_s13 = spop %3261 }
 0x5bf   : > { %v2461_v44 = vstv %s3262_s13  ;;  %s3264_s6 = spop %3263 }
 0x5c0   : > { %v2462_v33 = vadd.f32 %v2461_v44, %v2434_v21  ;;  %v2489_v15 = vstv %s3264_s6 }
 0x5c1   : > { %v2490_v14 = vadd.f32 %v2489_v15, %v2465_v13 }
 0x5c2   : > { %2464 = vst.msk [vmem:[#allocation5] sm:$0x1] %vm2463_vm4, %v2462_v33 }
 0x5c3   : > { %2491 = vst.msk [vmem:[#allocation6] sm:$0x1] %vm2463_vm4, %v2490_v14 }
 0x5c9   : > { %v2496_v57 = vld [vmem:[#allocation5] sm:$0x1] }
 0x5ca   : > { %v2497_v4 = vld [vmem:[#allocation6] sm:$0x1] }
 0x5cb   : > { %3388 = vrcp.f32 %v2497_v4 }
 0x5d5   : > { %v3389_v3 = vpop.eup %3388 }
 0x5d6   : > { %v2499_v8 = vmul.f32 %v3389_v3, %v2496_v57 }
 0x5d8   : > { %2500 = vst.msk [vmem:[#allocation12] sm:$0x1] %vm2463_vm4, %v2499_v8 }
 0x5d9 PF: > { %s6020_s23 = sadd.s32 4294967295, %s3550_s22   ;;  %s3567_s7 = smov [#allocation12]  }
 0x5da   : > { %p5406_p1 = scmp.eq.s32.totalorder %s6020_s23, 3  ;;  %s2508_s5 = sshll.u32 %s3567_s7, 4  ;;  %s2509_s5 = int_to_ptr.vmem [resolvable:$true] %s2508_s5 }
 0x5db   : > { %s3450_s18 = scalar_lea.vmem %s2509_s5, 16  ;;  %s3456_s25 = scalar_lea.vmem %s2509_s5, 32 }
 0x5dc   : > { %p3451_p6 = scmp.ne.s32.totalorder %s2509_s5, %s3450_s18  ;;  %p3457_p0 = scmp.lt.s32.totalorder %s2509_s5, %s2509_s5 }
 0x5dd   : > { %p3458_p2 = scmp.lt.s32.totalorder %s3456_s25, %s3450_s18 }
 0x5de   : > { %p3452_p8 = pnand %p3451_p6, %p5406_p1 }
 0x5df   : > { %p3459_p7 = por %p3458_p2, %p3457_p0 }
 0x5e0   : > { %p3453_p12 = pneg %p3452_p8 }
 0x5e2   : > { %p3460_p10 = pnand %p3459_p7, %p3453_p12 }
 0x5e4   : > { %3463 = shalt.err (!%p3460_p10)
}
 0x5e5   : > { %s3464_s30 = scalar_lea.hbm %s5460_s4, 16 }
 0x5e6   : > { %p3465_p13 = scmp.ne.s32.totalorder %s5460_s4, %s3464_s30  ;;  %p3470_p3 = scmp.lt.u32.totalorder %s3464_s30, %s5460_s4 }
 0x5e8   : > { %p3466_p5 = pnand %p3465_p13, %p5406_p1 }
 0x5ea   : > { %p3467_p9 = pneg %p3466_p5 }
 0x5ec   : > { %p3472_p4 = pnand %p3470_p3, %p3467_p9 }
 0x5ee   : > { %3475 = shalt.err (!%p3472_p4)
}
 0x5ef   : > { %3270 = dma.vmem_to_hbm [thread:$0]  (%p5406_p1), %s2509_s5, 16, %s5460_s4, [#allocation9]  }
 0x5f0   : > { %3517 = dma.done.wait (%p5406_p1), [#allocation9], 16  }
 0x5f1   : > { %3519 = vsyncadd (%p5406_p1), [#allocation9], 4294967280 }
 0x5f2 PF: > { %s21_s22 = sadd.s32 1, %s3550_s22   ;;  %s6022_s8 = sld [smem:[#allocation16_spill]] }
 0x5f3   : > { %p18_p11 = scmp.ge.s32.totalorder %s21_s22, 6   ;;  %s6023_s15 = smov %s3526_s16 }
 0x5f4   : > { %s6024_s16 = smov %s3530_s17  ;;  %s6025_s17 = smov %s3675_s14 }
 0x5f5   : > { %s6026_s18 = smov %s3542_s20  ;;  %s6027_s19 = smov %s3546_s21 }
 0x5f6   : > { %s6028_s20 = smov %s6031_s24  ;;  %20 = sbr.rel (!%p18_p11) target bundleno = 10 (0xa), region = 110 }
 0x5f8   : > { %s6029_s21 = smov %s6022_s8 }
 0x5fd   :  { %2521 = vsyncpa [#allocation8], 1 }
 0x5fe   :  { %2523 = vsyncpa [#allocation8 + $0x1], 1 }
 0x5ff   :  { %2524 = vsyncpa [#allocation11], 1 }
 0x600   :  { %2526 = vsyncpa [#allocation11 + $0x1], 1 }
 0x601   :  { %2527 = vsyncpa [#allocation9], 1 }
 0x602   :  { %2529 = vsyncpa [#allocation9 + $0x1], 1 }

</bundles_post_ra>
